<compile_context>
chip_gen: v7x
topology: tpu7x:2x2x1
jax: 0.10.0
libtpu: 0.0.40
codegen_flags: <defaults>
</compile_context>

<pallas_src>
import jax
import jax.numpy as jnp
from jax.experimental import pallas as pl
from jax.experimental.pallas import tpu as pltpu


_LANE = 128
_SUBLANE = 8
_F_PAD = 128                              # position features (3) padded to a full lane group
_TILE_VMEM_BUDGET = 20 * 1024 * 1024      # bytes allowed for tiles + resident weights
_VMEM_LIMIT = 32 * 1024 * 1024            # scoped VMEM limit, safe on v5e/v6e/v7x


def _round_up(x, m):
    return (x + m - 1) // m * m


def _pos2weight_kernel(x_ref, w1_ref, b1_ref, w2_ref, b2_ref, o_ref):
    # x_ref:  (tm, 128)       padded position tile (cols 3.. are zero)
    # w1_ref: (128, H)        first linear weight (rows 3.. are zero)
    # b1_ref: (1, H)
    # w2_ref: (H, OUT_pad)    second linear weight (cols OUT.. are zero)
    # b2_ref: (1, OUT_pad)
    # o_ref:  (tm, OUT_pad)   lane-dense output tile
    h = jnp.dot(x_ref[...], w1_ref[...], preferred_element_type=jnp.float32)
    h = jnp.maximum(h + b1_ref[...], 0.0)                       # ReLU
    out = jnp.dot(h, w2_ref[...], preferred_element_type=jnp.float32) + b2_ref[...]
    o_ref[...] = out.astype(o_ref.dtype)


def _choose_tm(n, hidden, out_pad):
    """Row tile sized from a VMEM budget (weights resident once, tiles double-buffered)."""
    weight_bytes = 4 * (_F_PAD * hidden + hidden + hidden * out_pad + out_pad)
    # per output row: double-buffered x tile + out tile, plus the f32 hidden temp
    per_row = 4 * (2 * (_F_PAD + out_pad) + hidden)
    tm = (_TILE_VMEM_BUDGET - weight_bytes) // max(per_row, 1)
    tm = max(256, min(int(tm), 4096))
    # keep >= 2 grid steps when the workload allows it (v7x has 2 TensorCores)
    if n > 2 * 256:
        tm = min(tm, _round_up(-(-n // 2), _SUBLANE))
    tm = min(tm, _round_up(n, _SUBLANE))      # don't over-pad tiny batches
    return _round_up(tm, _SUBLANE)


def pos2weight(x, w1, b1, w2, b2, *, tm=None):
    """Meta-SR Pos2Weight forward: relu(x @ w1 + b1) @ w2 + b2.

    x:  (N, 3) f32 position vectors
    w1: (3, H), b1: (H,), w2: (H, OUT), b2: (OUT,)
    returns (N, OUT) f32
    """
    n, f = x.shape
    hidden = w1.shape[1]
    out_dim = w2.shape[1]
    assert w1.shape[0] == f and w2.shape[0] == hidden

    out_pad = _round_up(out_dim, _LANE)
    if tm is None:
        tm = _choose_tm(n, hidden, out_pad)
    n_pad = _round_up(n, tm)
    grid = (n_pad // tm,)

    # ---- wrapper-side zero padding (sliced off after the kernel) ------------
    xp = jnp.zeros((n_pad, _F_PAD), jnp.float32).at[:n, :f].set(x)
    w1p = jnp.zeros((_F_PAD, hidden), jnp.float32).at[:f, :].set(w1)
    b1p = b1.reshape(1, hidden).astype(jnp.float32)
    w2p = jnp.zeros((hidden, out_pad), jnp.float32).at[:, :out_dim].set(w2)
    b2p = jnp.zeros((1, out_pad), jnp.float32).at[:, :out_dim].set(
        b2.reshape(1, out_dim))

    def _build_and_call(single_buffer_weights):
        # Grid-invariant operands: single-buffer them when supported.
        w_kwargs = (
            dict(pipeline_mode=pl.Buffered(1)) if single_buffer_weights else {}
        )
        in_specs = [
            pl.BlockSpec((tm, _F_PAD), lambda i: (i, 0)),                      # x tile
            pl.BlockSpec((_F_PAD, hidden), lambda i: (0, 0), **w_kwargs),      # w1
            pl.BlockSpec((1, hidden), lambda i: (0, 0), **w_kwargs),           # b1
            pl.BlockSpec((hidden, out_pad), lambda i: (0, 0), **w_kwargs),     # w2
            pl.BlockSpec((1, out_pad), lambda i: (0, 0), **w_kwargs),          # b2
        ]
        fn = pl.pallas_call(
            _pos2weight_kernel,
            out_shape=jax.ShapeDtypeStruct((n_pad, out_pad), jnp.float32),
            grid_spec=pltpu.PrefetchScalarGridSpec(
                num_scalar_prefetch=0,
                grid=grid,
                in_specs=in_specs,
                out_specs=pl.BlockSpec((tm, out_pad), lambda i: (i, 0)),
            ),
            compiler_params=pltpu.CompilerParams(
                dimension_semantics=("parallel",),
                vmem_limit_bytes=_VMEM_LIMIT,
            ),
        )
        return fn(xp, w1p, b1p, w2p, b2p)

    try:
        out_padded = _build_and_call(True)
    except Exception:
        # pipeline_mode / Buffered(1) unsupported on this jax version ->
        # fall back to default double-buffering (correctness identical).
        out_padded = _build_and_call(False)

    return out_padded[:n, :out_dim]


def init_pos2weight_params(key, inC, kernel_size=1, outC=3, hidden=256):
    """Deterministic init mimicking nn.Linear default (uniform +-1/sqrt(fan_in))."""
    out_dim = kernel_size * kernel_size * inC * outC
    k1, k2, k3, k4 = jax.random.split(key, 4)
    bound1 = 1.0 / jnp.sqrt(3.0)
    bound2 = 1.0 / jnp.sqrt(float(hidden))
    # stored as (in_features, out_features) so the kernel computes x @ W
    w1 = jax.random.uniform(k1, (3, hidden), jnp.float32, -bound1, bound1)
    b1 = jax.random.uniform(k2, (hidden,), jnp.float32, -bound1, bound1)
    w2 = jax.random.uniform(k3, (hidden, out_dim), jnp.float32, -bound2, bound2)
    b2 = jax.random.uniform(k4, (out_dim,), jnp.float32, -bound2, bound2)
    return w1, b1, w2, b2


if __name__ == "__main__":
    key = jax.random.PRNGKey(0)
    kp, kx = jax.random.split(key)

    inC, kernel_size, outC = 4, 1, 3          # out_dim = 1*1*4*3 = 12
    N = 256                                   # e.g. 16x16 output positions

    w1, b1, w2, b2 = init_pos2weight_params(kp, inC, kernel_size, outC)
    x = jax.random.normal(kx, (N, 3), jnp.float32)

    out = pos2weight(x, w1, b1, w2, b2)
    out = jax.block_until_ready(out)

    # reference check in plain JAX (unpadded math)
    ref = jnp.maximum(x @ w1 + b1, 0.0) @ w2 + b2
    assert out.shape == (N, kernel_size * kernel_size * inC * outC)
    assert jnp.allclose(out, ref, atol=1e-4, rtol=1e-4)

    print("KERNEL_OK")
</pallas_src>

<mosaic_0001>
module attributes {stable_mosaic.version = 11 : i64} {
  func.func @_pos2weight_kernel(%arg0: i32, %arg1: memref<256x128xf32, #tpu.memory_space<vmem>>, %arg2: memref<128x256xf32, #tpu.memory_space<vmem>>, %arg3: memref<1x256xf32, #tpu.memory_space<vmem>>, %arg4: memref<256x128xf32, #tpu.memory_space<vmem>>, %arg5: memref<1x128xf32, #tpu.memory_space<vmem>>, %arg6: memref<256x128xf32, #tpu.memory_space<vmem>>) attributes {dimension_semantics = [#tpu.dimension_semantics<parallel>], iteration_bounds = array<i64: 1>, scalar_prefetch = 0 : i64, scratch_operands = 0 : i64, tpu.core_type = #tpu.core_type<tc>, window_params = [{transform_indices = @transform_0, window_bounds = array<i64: 256, 128>}, {pipeline_mode = #tpu.pipeline_mode<synchronous>, transform_indices = @transform_1, window_bounds = array<i64: 128, 256>}, {pipeline_mode = #tpu.pipeline_mode<synchronous>, transform_indices = @transform_2, window_bounds = array<i64: 1, 256>}, {pipeline_mode = #tpu.pipeline_mode<synchronous>, transform_indices = @transform_3, window_bounds = array<i64: 256, 128>}, {pipeline_mode = #tpu.pipeline_mode<synchronous>, transform_indices = @transform_4, window_bounds = array<i64: 1, 128>}, {transform_indices = @transform_5, window_bounds = array<i64: 256, 128>}]} {
    %c0 = arith.constant 0 : index
    %c0_0 = arith.constant 0 : index
    %0 = vector.load %arg1[%c0, %c0_0] : memref<256x128xf32, #tpu.memory_space<vmem>>, vector<256x128xf32>
    %c0_1 = arith.constant 0 : index
    %c0_2 = arith.constant 0 : index
    %1 = vector.load %arg2[%c0_1, %c0_2] : memref<128x256xf32, #tpu.memory_space<vmem>>, vector<128x256xf32>
    %cst = arith.constant dense<0.000000e+00> : vector<256x256xf32>
    %2 = tpu.matmul %0, %1, %cst {dimension_numbers = #tpu.dot_dimension_numbers<[1], [0], [0], [1], [0, 0, 1, 1], [], []>} : vector<256x128xf32>, vector<128x256xf32>, vector<256x256xf32> -> vector<256x256xf32>
    %c0_3 = arith.constant 0 : index
    %c0_4 = arith.constant 0 : index
    %3 = vector.load %arg3[%c0_3, %c0_4] : memref<1x256xf32, #tpu.memory_space<vmem>>, vector<1x256xf32>
    %4 = vector.broadcast %3 : vector<1x256xf32> to vector<256x256xf32>
    %5 = arith.addf %2, %4 : vector<256x256xf32>
    %cst_5 = arith.constant 0.000000e+00 : f32
    %6 = vector.broadcast %cst_5 : f32 to vector<256x256xf32>
    %7 = arith.maximumf %5, %6 : vector<256x256xf32>
    %c0_6 = arith.constant 0 : index
    %c0_7 = arith.constant 0 : index
    %8 = vector.load %arg4[%c0_6, %c0_7] : memref<256x128xf32, #tpu.memory_space<vmem>>, vector<256x128xf32>
    %cst_8 = arith.constant dense<0.000000e+00> : vector<256x128xf32>
    %9 = tpu.matmul %7, %8, %cst_8 {dimension_numbers = #tpu.dot_dimension_numbers<[1], [0], [0], [1], [0, 0, 1, 1], [], []>} : vector<256x256xf32>, vector<256x128xf32>, vector<256x128xf32> -> vector<256x128xf32>
    %c0_9 = arith.constant 0 : index
    %c0_10 = arith.constant 0 : index
    %10 = vector.load %arg5[%c0_9, %c0_10] : memref<1x128xf32, #tpu.memory_space<vmem>>, vector<1x128xf32>
    %11 = vector.broadcast %10 : vector<1x128xf32> to vector<256x128xf32>
    %12 = arith.addf %9, %11 : vector<256x128xf32>
    %c0_11 = arith.constant 0 : index
    %c0_12 = arith.constant 0 : index
    %13 = vector.load %arg6[%c0_11, %c0_12] : memref<256x128xf32, #tpu.memory_space<vmem>>, vector<256x128xf32>
    tpu.vector_store %arg6[%c0_11, %c0_12], %12 {strides = array<i32>} : memref<256x128xf32, #tpu.memory_space<vmem>>, vector<256x128xf32>,
    return
  }
  func.func @transform_0(%arg0: i32) -> (i32, i32) {
    %c0_i32 = arith.constant 0 : i32
    %c0_i32_0 = arith.constant 0 : i32
    return %arg0, %c0_i32 : i32, i32
  }
  func.func @transform_1(%arg0: i32) -> (i32, i32) {
    %c0_i32 = arith.constant 0 : i32
    %c0_i32_0 = arith.constant 0 : i32
    %c0_i32_1 = arith.constant 0 : i32
    return %c0_i32, %c0_i32_0 : i32, i32
  }
  func.func @transform_2(%arg0: i32) -> (i32, i32) {
    %c0_i32 = arith.constant 0 : i32
    %c0_i32_0 = arith.constant 0 : i32
    %c0_i32_1 = arith.constant 0 : i32
    return %c0_i32, %c0_i32_0 : i32, i32
  }
  func.func @transform_3(%arg0: i32) -> (i32, i32) {
    %c0_i32 = arith.constant 0 : i32
    %c0_i32_0 = arith.constant 0 : i32
    %c0_i32_1 = arith.constant 0 : i32
    return %c0_i32, %c0_i32_0 : i32, i32
  }
  func.func @transform_4(%arg0: i32) -> (i32, i32) {
    %c0_i32 = arith.constant 0 : i32
    %c0_i32_0 = arith.constant 0 : i32
    %c0_i32_1 = arith.constant 0 : i32
    return %c0_i32, %c0_i32_0 : i32, i32
  }
  func.func @transform_5(%arg0: i32) -> (i32, i32) {
    %c0_i32 = arith.constant 0 : i32
    %c0_i32_0 = arith.constant 0 : i32
    return %arg0, %c0_i32 : i32, i32
  }
}

module attributes {stable_mosaic.version = 11 : i64} {
  func.func @_pos2weight_kernel(%arg0: i32, %arg1: memref<256x128xf32, #tpu.memory_space<vmem>>, %arg2: memref<128x256xf32, #tpu.memory_space<vmem>>, %arg3: memref<1x256xf32, #tpu.memory_space<vmem>>, %arg4: memref<256x128xf32, #tpu.memory_space<vmem>>, %arg5: memref<1x128xf32, #tpu.memory_space<vmem>>, %arg6: memref<256x128xf32, #tpu.memory_space<vmem>>) attributes {dimension_semantics = [#tpu.dimension_semantics<parallel>], iteration_bounds = array<i64: 1>, scalar_prefetch = 0 : i64, scratch_operands = 0 : i64, tpu.core_type = #tpu.core_type<tc>, window_params = [{transform_indices = @transform_0, window_bounds = array<i64: 256, 128>}, {pipeline_mode = #tpu.pipeline_mode<synchronous>, transform_indices = @transform_1, window_bounds = array<i64: 128, 256>}, {pipeline_mode = #tpu.pipeline_mode<synchronous>, transform_indices = @transform_2, window_bounds = array<i64: 1, 256>}, {pipeline_mode = #tpu.pipeline_mode<synchronous>, transform_indices = @transform_3, window_bounds = array<i64: 256, 128>}, {pipeline_mode = #tpu.pipeline_mode<synchronous>, transform_indices = @transform_4, window_bounds = array<i64: 1, 128>}, {transform_indices = @transform_5, window_bounds = array<i64: 256, 128>}]} {
    %c0 = arith.constant 0 : index
    %c0_0 = arith.constant 0 : index
    %0 = vector.load %arg1[%c0, %c0_0] : memref<256x128xf32, #tpu.memory_space<vmem>>, vector<256x128xf32>
    %c0_1 = arith.constant 0 : index
    %c0_2 = arith.constant 0 : index
    %1 = vector.load %arg2[%c0_1, %c0_2] : memref<128x256xf32, #tpu.memory_space<vmem>>, vector<128x256xf32>
    %cst = arith.constant dense<0.000000e+00> : vector<256x256xf32>
    %2 = tpu.matmul %0, %1, %cst {dimension_numbers = #tpu.dot_dimension_numbers<[1], [0], [0], [1], [0, 0, 1, 1], [], []>} : vector<256x128xf32>, vector<128x256xf32>, vector<256x256xf32> -> vector<256x256xf32>
    %c0_3 = arith.constant 0 : index
    %c0_4 = arith.constant 0 : index
    %3 = vector.load %arg3[%c0_3, %c0_4] : memref<1x256xf32, #tpu.memory_space<vmem>>, vector<1x256xf32>
    %4 = vector.broadcast %3 : vector<1x256xf32> to vector<256x256xf32>
    %5 = arith.addf %2, %4 : vector<256x256xf32>
    %cst_5 = arith.constant 0.000000e+00 : f32
    %6 = vector.broadcast %cst_5 : f32 to vector<256x256xf32>
    %7 = arith.maximumf %5, %6 : vector<256x256xf32>
    %c0_6 = arith.constant 0 : index
    %c0_7 = arith.constant 0 : index
    %8 = vector.load %arg4[%c0_6, %c0_7] : memref<256x128xf32, #tpu.memory_space<vmem>>, vector<256x128xf32>
    %cst_8 = arith.constant dense<0.000000e+00> : vector<256x128xf32>
    %9 = tpu.matmul %7, %8, %cst_8 {dimension_numbers = #tpu.dot_dimension_numbers<[1], [0], [0], [1], [0, 0, 1, 1], [], []>} : vector<256x256xf32>, vector<256x128xf32>, vector<256x128xf32> -> vector<256x128xf32>
    %c0_9 = arith.constant 0 : index
    %c0_10 = arith.constant 0 : index
    %10 = vector.load %arg5[%c0_9, %c0_10] : memref<1x128xf32, #tpu.memory_space<vmem>>, vector<1x128xf32>
    %11 = vector.broadcast %10 : vector<1x128xf32> to vector<256x128xf32>
    %12 = arith.addf %9, %11 : vector<256x128xf32>
    %c0_11 = arith.constant 0 : index
    %c0_12 = arith.constant 0 : index
    %13 = vector.load %arg6[%c0_11, %c0_12] : memref<256x128xf32, #tpu.memory_space<vmem>>, vector<256x128xf32>
    tpu.vector_store %arg6[%c0_11, %c0_12], %12 {strides = array<i32>} : memref<256x128xf32, #tpu.memory_space<vmem>>, vector<256x128xf32>,
    return
  }
  func.func @transform_0(%arg0: i32) -> (i32, i32) {
    %c0_i32 = arith.constant 0 : i32
    %c0_i32_0 = arith.constant 0 : i32
    return %arg0, %c0_i32 : i32, i32
  }
  func.func @transform_1(%arg0: i32) -> (i32, i32) {
    %c0_i32 = arith.constant 0 : i32
    %c0_i32_0 = arith.constant 0 : i32
    %c0_i32_1 = arith.constant 0 : i32
    return %c0_i32, %c0_i32_0 : i32, i32
  }
  func.func @transform_2(%arg0: i32) -> (i32, i32) {
    %c0_i32 = arith.constant 0 : i32
    %c0_i32_0 = arith.constant 0 : i32
    %c0_i32_1 = arith.constant 0 : i32
    return %c0_i32, %c0_i32_0 : i32, i32
  }
  func.func @transform_3(%arg0: i32) -> (i32, i32) {
    %c0_i32 = arith.constant 0 : i32
    %c0_i32_0 = arith.constant 0 : i32
    %c0_i32_1 = arith.constant 0 : i32
    return %c0_i32, %c0_i32_0 : i32, i32
  }
  func.func @transform_4(%arg0: i32) -> (i32, i32) {
    %c0_i32 = arith.constant 0 : i32
    %c0_i32_0 = arith.constant 0 : i32
    %c0_i32_1 = arith.constant 0 : i32
    return %c0_i32, %c0_i32_0 : i32, i32
  }
  func.func @transform_5(%arg0: i32) -> (i32, i32) {
    %c0_i32 = arith.constant 0 : i32
    %c0_i32_0 = arith.constant 0 : i32
    return %arg0, %c0_i32 : i32, i32
  }
}

</mosaic_0001>

<bundles_post_ra>
// kernel: tpu_custom_call.1
= control target key start
LH: loop header
LB: loop body
LE: loop exit
PB: predicated region body
PF: predicated region fallthrough
CT: control target
= control target key end

     0   :  { %10 = vsyncpa [#allocation3], 0  ;;  %s1259_s0 = inlined_call_operand.hbm [shape: f32[256,128], index: 0, kind: input, shape index: {}]   ;;  %s1260_s1 = inlined_call_operand.hbm [shape: f32[128,256], index: 1, kind: input, shape index: {}]   ;;  %s1261_s2 = inlined_call_operand.vmem [shape: f32[1,256], index: 2, kind: input, shape index: {}]   ;;  %s1262_s3 = inlined_call_operand.hbm [shape: f32[256,128], index: 3, kind: input, shape index: {}]   ;;  %s1263_s4 = inlined_call_operand.vmem [shape: f32[1,128], index: 4, kind: input, shape index: {}]   ;;  %s1264_s5 = inlined_call_operand.hbm [shape: f32[256,128], index: 5, kind: output, shape index: {}]  }
   0x1   :  { %11 = vsyncpa [#allocation6], 0 }
   0x2   :  { %12 = vsyncpa [#allocation4], 0  ;;  %s990_s18 = smov [#allocation5]   ;;  %s896_s22 = scalar_lea.hbm %s1260_s1, 4096 }
   0x3   :  { %s30_s19 = sshll.u32 %s990_s18, 4  ;;  %p897_p0 = scmp.ne.s32.totalorder %s1260_s1, %s896_s22  ;;  %s31_s19 = int_to_ptr.vmem [resolvable:$true] %s30_s19 }
   0x4   :  { %p900_p1 = scmp.lt.u32.totalorder %s896_s22, %s1260_s1 }
   0x6   :  { %p902_p2 = pnand %p900_p1, %p897_p0 }
   0x8   :  { %905 = shalt.err (!%p902_p2)
}
   0x9   :  { %s906_s27 = scalar_lea.vmem %s31_s19, 4096  ;;  %p911_p4 = scmp.lt.s32.totalorder %s31_s19, %s31_s19 }
   0xa   :  { %p907_p3 = scmp.ne.s32.totalorder %s31_s19, %s906_s27  ;;  %p912_p5 = scmp.lt.s32.totalorder %s906_s27, %s906_s27 }
   0xc   :  { %p913_p6 = por %p912_p5, %p911_p4 }
   0xe   :  { %p914_p7 = pnand %p913_p6, %p907_p3 }
  0x10   :  { %917 = shalt.err (!%p914_p7)
}
  0x11   :  { %s991_s28 = smov 256   ;;  %s992_s29 = smov 16  }
  0x12   :  { %36 = dma.hbm_to_vmem [thread:$0]  %s1260_s1, 4096, %s31_s19, [#allocation6], %s991_s28, %s991_s28, %s992_s29  }
  0x13   :  { %s993_s7 = smov [#allocation2]   ;;  %s918_s11 = scalar_lea.hbm %s1259_s0, 4096 }
  0x14   :  { %s18_s8 = sshll.u32 %s993_s7, 4  ;;  %p919_p8 = scmp.ne.s32.totalorder %s1259_s0, %s918_s11  ;;  %s19_s8 = int_to_ptr.vmem [resolvable:$true] %s18_s8 }
  0x15   :  { %p922_p9 = scmp.lt.u32.totalorder %s918_s11, %s1259_s0 }
  0x17   :  { %p924_p10 = pnand %p922_p9, %p919_p8 }
  0x19   :  { %927 = shalt.err (!%p924_p10)
}
  0x1a   :  { %s928_s16 = scalar_lea.vmem %s19_s8, 4096  ;;  %p933_p12 = scmp.lt.s32.totalorder %s19_s8, %s19_s8 }
  0x1b   :  { %p929_p11 = scmp.ne.s32.totalorder %s19_s8, %s928_s16  ;;  %p934_p13 = scmp.lt.s32.totalorder %s928_s16, %s928_s16 }
  0x1d   :  { %p935_p0 = por %p934_p13, %p933_p12 }
  0x1f   :  { %p936_p1 = pnand %p935_p0, %p929_p11 }
  0x21   :  { %939 = shalt.err (!%p936_p1)
}
  0x22   :  { %s994_s1 = smov 128   ;;  %s995_s17 = smov 8  }
  0x23   :  { %24 = dma.hbm_to_vmem [thread:$0]  %s1259_s0, 4096, %s19_s8, [#allocation3], %s994_s1, %s994_s1, %s995_s17  }
  0x24   :  { %s996_s20 = smov [#allocation7]   ;;  %s940_s24 = scalar_lea.hbm %s1262_s3, 4096 }
  0x25   :  { %s44_s21 = sshll.u32 %s996_s20, 4  ;;  %p941_p2 = scmp.ne.s32.totalorder %s1262_s3, %s940_s24  ;;  %s45_s21 = int_to_ptr.vmem [resolvable:$true] %s44_s21 }
  0x26   :  { %p944_p3 = scmp.lt.u32.totalorder %s940_s24, %s1262_s3 }
  0x28   :  { %p946_p4 = pnand %p944_p3, %p941_p2 }
  0x2a   :  { %949 = shalt.err (!%p946_p4)
}
  0x2b   :  { %s950_s29 = scalar_lea.vmem %s45_s21, 4096  ;;  %p955_p6 = scmp.lt.s32.totalorder %s45_s21, %s45_s21 }
  0x2c   :  { %p951_p5 = scmp.ne.s32.totalorder %s45_s21, %s950_s29  ;;  %p956_p7 = scmp.lt.s32.totalorder %s950_s29, %s950_s29 }
  0x2e   :  { %p957_p8 = por %p956_p7, %p955_p6 }
  0x30   :  { %p958_p9 = pnand %p957_p8, %p951_p5 }
  0x32   :  { %961 = shalt.err (!%p958_p9)
}
  0x33   :  { %50 = dma.hbm_to_vmem [thread:$0]  %s1262_s3, 4096, %s45_s21, [#allocation6], %s994_s1, %s994_s1, %s995_s17  }
  0x34   :  { %984 = dma.done.wait [#allocation3], 4096  }
  0x35   :  { %985 = vsyncadd [#allocation3], 4294963200 }
  0x36   :  { %986 = dma.done.wait [#allocation6], 8192  }
  0x37   :  { %987 = vsyncadd [#allocation6], 4294959104  ;;  %v997_v0 = vmov 0.0   ;;  %v95_v1 = vld [vmem:[#allocation5 + $0x8] sm:$0xff]  ;;  %v97_v2 = vld [vmem:[#allocation5 + $0x18] sm:$0xff]  ;;  %v998_v53 = vmov 0.0|0.0  }
  0x38   :  { %202 = vmatprep.mubr.f32.mxu0 %v997_v0  ;;  %v94_v3 = vld [vmem:[#allocation5] sm:$0xff]  ;;  %v774_v4 = vpack.c.bf16 %v97_v2, %v95_v1  ;;  %v96_v5 = vld [vmem:[#allocation5 + $0x10] sm:$0xff]  ;;  %v99_v6 = vld [vmem:[#allocation5 + $0x28] sm:$0xff]  ;;  %854 = vmatprep.subr.bf16.mxu1 %v998_v53 }
  0x39   :  { %v101_v7 = vld [vmem:[#allocation5 + $0x38] sm:$0xff]  ;;  %v776_v8 = vpack.c.bf16 %v96_v5, %v94_v3  ;;  %v98_v10 = vld [vmem:[#allocation5 + $0x20] sm:$0xff]  ;;  %v100_v11 = vld [vmem:[#allocation5 + $0x30] sm:$0xff] }
  0x3a   :  { %v778_v9 = vpack.c.bf16 %v101_v7, %v99_v6  ;;  %v103_v12 = vld [vmem:[#allocation5 + $0x48] sm:$0xff]  ;;  %775 = vmatprep.subr.bf16.mxu0 %v774_v4  ;;  %v105_v13 = vld [vmem:[#allocation5 + $0x58] sm:$0xff]  ;;  %v780_v14 = vpack.c.bf16 %v100_v11, %v98_v10  ;;  %v102_v16 = vld [vmem:[#allocation5 + $0x40] sm:$0xff] }
  0x3b   :  { %777 = vmatpush1.bf16.msra.mxu0 %v776_v8  ;;  %v782_v15 = vpack.c.bf16 %v105_v13, %v103_v12  ;;  %v104_v17 = vld [vmem:[#allocation5 + $0x50] sm:$0xff]  ;;  %v107_v18 = vld [vmem:[#allocation5 + $0x68] sm:$0xff]  ;;  %v109_v19 = vld [vmem:[#allocation5 + $0x78] sm:$0xff] }
  0x3c   :  { %779 = vmatprep.subr.bf16.mxu0 %v778_v9  ;;  %v784_v20 = vpack.c.bf16 %v104_v17, %v102_v16  ;;  %v786_v21 = vpack.c.bf16 %v109_v19, %v107_v18  ;;  %v106_v22 = vld [vmem:[#allocation5 + $0x60] sm:$0xff]  ;;  %v108_v23 = vld [vmem:[#allocation5 + $0x70] sm:$0xff]  ;;  %v111_v24 = vld [vmem:[#allocation5 + $0x88] sm:$0xff] }
  0x3d   :  { %v113_v25 = vld [vmem:[#allocation5 + $0x98] sm:$0xff]  ;;  %v788_v26 = vpack.c.bf16 %v108_v23, %v106_v22  ;;  %v110_v28 = vld [vmem:[#allocation5 + $0x80] sm:$0xff]  ;;  %v112_v29 = vld [vmem:[#allocation5 + $0x90] sm:$0xff] }
  0x3e   :  { %v790_v27 = vpack.c.bf16 %v113_v25, %v111_v24  ;;  %v115_v30 = vld [vmem:[#allocation5 + $0xa8] sm:$0xff]  ;;  %v117_v31 = vld [vmem:[#allocation5 + $0xb8] sm:$0xff]  ;;  %v792_v32 = vpack.c.bf16 %v112_v29, %v110_v28  ;;  %v114_v34 = vld [vmem:[#allocation5 + $0xa0] sm:$0xff] }
  0x3f   :  { %781 = vmatpush1.bf16.msra.mxu0 %v780_v14  ;;  %v794_v33 = vpack.c.bf16 %v117_v31, %v115_v30  ;;  %v116_v35 = vld [vmem:[#allocation5 + $0xb0] sm:$0xff]  ;;  %v119_v36 = vld [vmem:[#allocation5 + $0xc8] sm:$0xff]  ;;  %v121_v37 = vld [vmem:[#allocation5 + $0xd8] sm:$0xff] }
  0x40   :  { %783 = vmatprep.subr.bf16.mxu0 %v782_v15  ;;  %v796_v38 = vpack.c.bf16 %v116_v35, %v114_v34  ;;  %v798_v39 = vpack.c.bf16 %v121_v37, %v119_v36  ;;  %v118_v40 = vld [vmem:[#allocation5 + $0xc0] sm:$0xff]  ;;  %v120_v41 = vld [vmem:[#allocation5 + $0xd0] sm:$0xff]  ;;  %v123_v42 = vld [vmem:[#allocation5 + $0xe8] sm:$0xff] }
  0x41   :  { %v125_v43 = vld [vmem:[#allocation5 + $0xf8] sm:$0xff]  ;;  %v800_v44 = vpack.c.bf16 %v120_v41, %v118_v40  ;;  %v122_v46 = vld [vmem:[#allocation5 + $0xe0] sm:$0xff]  ;;  %v124_v47 = vld [vmem:[#allocation5 + $0xf0] sm:$0xff] }
  0x42   :  { %v802_v45 = vpack.c.bf16 %v125_v43, %v123_v42  ;;  %v804_v48 = vpack.c.bf16 %v124_v47, %v122_v46  ;;  %v459_v49 = vld [vmem:[#allocation7] sm:$0xff]  ;;  %v460_v50 = vld [vmem:[#allocation7 + $0x8] sm:$0xff]  ;;  %v461_v54 = vld [vmem:[#allocation7 + $0x10] sm:$0xff] }
  0x43   :  { %785 = vmatpush1.bf16.msra.mxu0 %v784_v20  ;;  %v62_v51 = vld [vmem:[#allocation2] sm:$0xff]  ;;  %v807_v52 = vpack.c.bf16 %v460_v50, %v459_v49  ;;  %v462_v55 = vld [vmem:[#allocation7 + $0x18] sm:$0xff]  ;;  %v63_v56 = vld [vmem:[#allocation2 + $0x8] sm:$0xff] }
  0x44   :  { %787 = vmatprep.subr.bf16.mxu0 %v786_v21  ;;  %v810_v57 = vpack.c.bf16 %v462_v55, %v461_v54  ;;  %v463_v58 = vld [vmem:[#allocation7 + $0x20] sm:$0xff]  ;;  %v464_v59 = vld [vmem:[#allocation7 + $0x28] sm:$0xff]  ;;  %v64_v60 = vld [vmem:[#allocation2 + $0x10] sm:$0xff] }
  0x45   :  { %870 = vmatpush1.bf16.msra.mxu1 %v807_v52  ;;  %v813_v61 = vpack.c.bf16 %v464_v59, %v463_v58  ;;  %v465_v62 = vld [vmem:[#allocation7 + $0x30] sm:$0xff]  ;;  %v466_v63 = vld [vmem:[#allocation7 + $0x38] sm:$0xff]  ;;  %v467_v3 = vld [vmem:[#allocation7 + $0x40] sm:$0xff] }
  0x46   :  { %855 = vmatprep.subr.bf16.mxu1 %v998_v53  ;;  %v65_v1 = vld [vmem:[#allocation2 + $0x18] sm:$0xff]  ;;  %v816_v2 = vpack.c.bf16 %v466_v63, %v465_v62  ;;  %v468_v4 = vld [vmem:[#allocation7 + $0x48] sm:$0xff]  ;;  %v66_v5 = vld [vmem:[#allocation2 + $0x20] sm:$0xff] }
  0x47   :  { %789 = vmatpush1.bf16.msra.mxu0 %v788_v26  ;;  %v819_v6 = vpack.c.bf16 %v468_v4, %v467_v3  ;;  %v469_v7 = vld [vmem:[#allocation7 + $0x50] sm:$0xff]  ;;  %v470_v8 = vld [vmem:[#allocation7 + $0x58] sm:$0xff]  ;;  %v67_v9 = vld [vmem:[#allocation2 + $0x28] sm:$0xff]  ;;  %v128_v4 = vlaneseq }
  0x48   :  { %791 = vmatprep.subr.bf16.mxu0 %v790_v27  ;;  %v822_v10 = vpack.c.bf16 %v470_v8, %v469_v7  ;;  %v471_v11 = vld [vmem:[#allocation7 + $0x60] sm:$0xff]  ;;  %v472_v12 = vld [vmem:[#allocation7 + $0x68] sm:$0xff]  ;;  %v68_v13 = vld [vmem:[#allocation2 + $0x30] sm:$0xff] }
  0x49   :  { %871 = vmatpush1.bf16.msra.mxu1 %v810_v57  ;;  %v825_v14 = vpack.c.bf16 %v472_v12, %v471_v11  ;;  %v473_v15 = vld [vmem:[#allocation7 + $0x70] sm:$0xff]  ;;  %v474_v16 = vld [vmem:[#allocation7 + $0x78] sm:$0xff]  ;;  %v475_v19 = vld [vmem:[#allocation7 + $0x80] sm:$0xff] }
  0x4a   :  { %856 = vmatprep.subr.bf16.mxu1 %v998_v53  ;;  %v69_v17 = vld [vmem:[#allocation2 + $0x38] sm:$0xff]  ;;  %v828_v18 = vpack.c.bf16 %v474_v16, %v473_v15  ;;  %v476_v20 = vld [vmem:[#allocation7 + $0x88] sm:$0xff]  ;;  %v70_v21 = vld [vmem:[#allocation2 + $0x40] sm:$0xff] }
  0x4b   :  { %793 = vmatpush1.bf16.msra.mxu0 %v792_v32  ;;  %v831_v22 = vpack.c.bf16 %v476_v20, %v475_v19  ;;  %v477_v23 = vld [vmem:[#allocation7 + $0x90] sm:$0xff]  ;;  %v478_v24 = vld [vmem:[#allocation7 + $0x98] sm:$0xff]  ;;  %v71_v25 = vld [vmem:[#allocation2 + $0x48] sm:$0xff] }
  0x4c   :  { %795 = vmatprep.subr.bf16.mxu0 %v794_v33  ;;  %v834_v26 = vpack.c.bf16 %v478_v24, %v477_v23  ;;  %v479_v27 = vld [vmem:[#allocation7 + $0xa0] sm:$0xff]  ;;  %v480_v28 = vld [vmem:[#allocation7 + $0xa8] sm:$0xff]  ;;  %v72_v29 = vld [vmem:[#allocation2 + $0x50] sm:$0xff] }
  0x4d   :  { %872 = vmatpush1.bf16.msra.mxu1 %v813_v61  ;;  %v837_v30 = vpack.c.bf16 %v480_v28, %v479_v27  ;;  %v481_v31 = vld [vmem:[#allocation7 + $0xb0] sm:$0xff]  ;;  %v482_v32 = vld [vmem:[#allocation7 + $0xb8] sm:$0xff]  ;;  %v483_v35 = vld [vmem:[#allocation7 + $0xc0] sm:$0xff] }
  0x4e   :  { %857 = vmatprep.subr.bf16.mxu1 %v998_v53  ;;  %v73_v33 = vld [vmem:[#allocation2 + $0x58] sm:$0xff]  ;;  %v840_v34 = vpack.c.bf16 %v482_v32, %v481_v31  ;;  %v484_v36 = vld [vmem:[#allocation7 + $0xc8] sm:$0xff]  ;;  %v74_v37 = vld [vmem:[#allocation2 + $0x60] sm:$0xff] }
  0x4f   :  { %797 = vmatpush1.bf16.msra.mxu0 %v796_v38  ;;  %v843_v38 = vpack.c.bf16 %v484_v36, %v483_v35  ;;  %v486_v40 = vld [vmem:[#allocation7 + $0xd8] sm:$0xff]  ;;  %v75_v41 = vld [vmem:[#allocation2 + $0x68] sm:$0xff]  ;;  %v76_v43 = vld [vmem:[#allocation2 + $0x70] sm:$0xff] }
  0x50   :  { %799 = vmatprep.subr.bf16.mxu0 %v798_v39  ;;  %v485_v39 = vld [vmem:[#allocation7 + $0xd0] sm:$0xff]  ;;  %v79_v46 = vld [vmem:[#allocation2 + $0x88] sm:$0xff]  ;;  %v82_v49 = vld [vmem:[#allocation2 + $0xa0] sm:$0xff] }
  0x51   :  { %873 = vmatpush1.bf16.msra.mxu1 %v816_v2  ;;  %v846_v42 = vpack.c.bf16 %v486_v40, %v485_v39  ;;  %v80_v47 = vld [vmem:[#allocation2 + $0x90] sm:$0xff]  ;;  %v487_v50 = vld [vmem:[#allocation7 + $0xe0] sm:$0xff]  ;;  %v85_v59 = vld [vmem:[#allocation2 + $0xb8] sm:$0xff] }
  0x52   :  { %858 = vmatprep.subr.bf16.mxu1 %v998_v53  ;;  %v489_v55 = vld [vmem:[#allocation7 + $0xf0] sm:$0xff]  ;;  %v90_v63 = vld [vmem:[#allocation2 + $0xe0] sm:$0xff]  ;;  %v93_v3 = vld [vmem:[#allocation2 + $0xf8] sm:$0xff] }
  0x53   :  { %801 = vmatpush1.bf16.msra.mxu0 %v800_v44  ;;  %v77_v44 = vld [vmem:[#allocation2 + $0x78] sm:$0xff]  ;;  %v88_v62 = vld [vmem:[#allocation2 + $0xd0] sm:$0xff]  ;;  %v126_v7 = vld [vmem:[%s1261_s2] sm:$0x3] }
  0x54   :  { %803 = vmatprep.subr.bf16.mxu0 %v802_v45  ;;  %v78_v45 = vld [vmem:[#allocation2 + $0x80] sm:$0xff] }
  0x55   :  { %874 = vmatpush1.bf16.msra.mxu1 %v819_v6 }
  0x56   :  { %859 = vmatprep.subr.bf16.mxu1 %v998_v53 }
  0x57   :  { %805 = vmatpush1.bf16.msra.mxu0 %v804_v48  ;;  %v81_v48 = vld [vmem:[#allocation2 + $0x98] sm:$0xff] }
  0x58   :  { %806 = vmatprep.subr.bf16.mxu0 %v998_v53 }
  0x59   :  { %875 = vmatpush1.bf16.msra.mxu1 %v822_v10 }
  0x5a   :  { %203 = vmatmul.mubr.f32.vlgmr.msra.gmra.mrb[0].mxu0 %v62_v51  ;;  %860 = vmatprep.subr.bf16.mxu1 %v998_v53  ;;  %v488_v51 = vld [vmem:[#allocation7 + $0xe8] sm:$0xff] }
  0x5b   :  { %208 = vmatprep.mubr.f32.mxu0 %v997_v0  ;;  %808 = vmatpush1.bf16.msra.mxu0 %v807_v52  ;;  %v83_v52 = vld [vmem:[#allocation2 + $0xa8] sm:$0xff]  ;;  %v849_v54 = vpack.c.bf16 %v488_v51, %v487_v50 }
  0x5c   :  { %809 = vmatprep.subr.bf16.mxu0 %v998_v53 }
  0x5d   :  { %876 = vmatpush1.bf16.msra.mxu1 %v825_v14 }
  0x5e   :  { %209 = vmatmul.mubr.f32.gmra.mrb[2].mxu0 %v63_v56  ;;  %861 = vmatprep.subr.bf16.mxu1 %v998_v53  ;;  %v490_v56 = vld [vmem:[#allocation7 + $0xf8] sm:$0xff] }
  0x5f   :  { %214 = vmatprep.mubr.f32.mxu0 %v997_v0  ;;  %811 = vmatpush1.bf16.msra.mxu0 %v810_v57  ;;  %v84_v57 = vld [vmem:[#allocation2 + $0xb0] sm:$0xff]  ;;  %v852_v58 = vpack.c.bf16 %v490_v56, %v489_v55 }
  0x60   :  { %812 = vmatprep.subr.bf16.mxu0 %v998_v53 }
  0x61   :  { %877 = vmatpush1.bf16.msra.mxu1 %v828_v18 }
  0x62   :  { %215 = vmatmul.mubr.f32.gmra.mrb[4].mxu0 %v64_v60  ;;  %862 = vmatprep.subr.bf16.mxu1 %v998_v53  ;;  %v86_v60 = vld [vmem:[#allocation2 + $0xc0] sm:$0xff] }
  0x63   :  { %220 = vmatprep.mubr.f32.mxu0 %v997_v0  ;;  %814 = vmatpush1.bf16.msra.mxu0 %v813_v61  ;;  %v87_v61 = vld [vmem:[#allocation2 + $0xc8] sm:$0xff] }
  0x64   :  { %815 = vmatprep.subr.bf16.mxu0 %v998_v53 }
  0x65   :  { %878 = vmatpush1.bf16.msra.mxu1 %v831_v22 }
  0x66   :  { %221 = vmatmul.mubr.f32.gmra.mrb[6].mxu0 %v65_v1  ;;  %863 = vmatprep.subr.bf16.mxu1 %v998_v53  ;;  %v91_v1 = vld [vmem:[#allocation2 + $0xe8] sm:$0xff] }
  0x67   :  { %226 = vmatprep.mubr.f32.mxu0 %v997_v0  ;;  %817 = vmatpush1.bf16.msra.mxu0 %v816_v2  ;;  %v92_v2 = vld [vmem:[#allocation2 + $0xf0] sm:$0xff] }
  0x68   :  { %818 = vmatprep.subr.bf16.mxu0 %v998_v53 }
  0x69   :  { %879 = vmatpush1.bf16.msra.mxu1 %v834_v26 }
  0x6a   :  { %227 = vmatmul.mubr.f32.gmra.mrb[8].mxu0 %v66_v5  ;;  %864 = vmatprep.subr.bf16.mxu1 %v998_v53  ;;  %v129_v5 = vshrl.u32 %v128_v4, 7 }
  0x6b   :  { %232 = vmatprep.mubr.f32.mxu0 %v997_v0  ;;  %820 = vmatpush1.bf16.msra.mxu0 %v819_v6 }
  0x6c   :  { %821 = vmatprep.subr.bf16.mxu0 %v998_v53  ;;  %v130_v6 = vsub.s32 0, %v129_v5  ;;  %v134_v8 = vsub.s32 1, %v129_v5 }
  0x6d   :  { %880 = vmatpush1.bf16.msra.mxu1 %v837_v30 }
  0x6e   :  { %233 = vmatmul.mubr.f32.gmra.mrb[10].mxu0 %v67_v9  ;;  %865 = vmatprep.subr.bf16.mxu1 %v998_v53  ;;  %v1139_v9 = vrot.slane %v126_v7, %v130_v6 }
  0x6f   :  { %238 = vmatprep.mubr.f32.mxu0 %v997_v0  ;;  %823 = vmatpush1.bf16.msra.mxu0 %v822_v10  ;;  %v1141_v10 = vrot.slane %v126_v7, %v134_v8 }
  0x70   :  { %824 = vmatprep.subr.bf16.mxu0 %v998_v53 }
  0x71   :  { %881 = vmatpush1.bf16.msra.mxu1 %v840_v34 }
  0x72   :  { %239 = vmatmul.mubr.f32.gmra.mrb[12].mxu0 %v68_v13  ;;  %866 = vmatprep.subr.bf16.mxu1 %v998_v53 }
  0x73   :  { %244 = vmatprep.mubr.f32.mxu0 %v997_v0  ;;  %826 = vmatpush1.bf16.msra.mxu0 %v825_v14 }
  0x74   :  { %827 = vmatprep.subr.bf16.mxu0 %v998_v53 }
  0x75   :  { %882 = vmatpush1.bf16.msra.mxu1 %v843_v38 }
  0x76   :  { %245 = vmatmul.mubr.f32.gmra.mrb[14].mxu0 %v69_v17  ;;  %867 = vmatprep.subr.bf16.mxu1 %v998_v53 }
  0x77   :  { %250 = vmatprep.mubr.f32.mxu0 %v997_v0  ;;  %829 = vmatpush1.bf16.msra.mxu0 %v828_v18 }
  0x78   :  { %830 = vmatprep.subr.bf16.mxu0 %v998_v53 }
  0x79   :  { %883 = vmatpush1.bf16.msra.mxu1 %v846_v42 }
  0x7a   :  { %251 = vmatmul.mubr.f32.gmra.mrb[16].mxu0 %v70_v21  ;;  %868 = vmatprep.subr.bf16.mxu1 %v998_v53 }
  0x7b   :  { %256 = vmatprep.mubr.f32.mxu0 %v997_v0  ;;  %832 = vmatpush1.bf16.msra.mxu0 %v831_v22 }
  0x7c   :  { %833 = vmatprep.subr.bf16.mxu0 %v998_v53 }
  0x7d   :  { %884 = vmatpush1.bf16.msra.mxu1 %v849_v54 }
  0x7e   :  { %257 = vmatmul.mubr.f32.gmra.mrb[18].mxu0 %v71_v25  ;;  %869 = vmatprep.subr.bf16.mxu1 %v998_v53 }
  0x7f   :  { %262 = vmatprep.mubr.f32.mxu0 %v997_v0  ;;  %835 = vmatpush1.bf16.msra.mxu0 %v834_v26 }
  0x80   :  { %836 = vmatprep.subr.bf16.mxu0 %v998_v53 }
  0x81   :  { %885 = vmatpush1.bf16.msra.mxu1 %v852_v58 }
  0x82   :  { %263 = vmatmul.mubr.f32.gmra.mrb[20].mxu0 %v72_v29 }
  0x83   :  { %268 = vmatprep.mubr.f32.mxu0 %v997_v0  ;;  %838 = vmatpush1.bf16.msra.mxu0 %v837_v30 }
  0x84   :  { %839 = vmatprep.subr.bf16.mxu0 %v998_v53 }
  0x86   :  { %269 = vmatmul.mubr.f32.gmra.mrb[22].mxu0 %v73_v33 }
  0x87   :  { %274 = vmatprep.mubr.f32.mxu0 %v997_v0  ;;  %841 = vmatpush1.bf16.msra.mxu0 %v840_v34 }
  0x88   :  { %842 = vmatprep.subr.bf16.mxu0 %v998_v53 }
  0x8a   :  { %275 = vmatmul.mubr.f32.gmra.mrb[24].mxu0 %v74_v37 }
  0x8b   :  { %280 = vmatprep.mubr.f32.mxu0 %v997_v0  ;;  %844 = vmatpush1.bf16.msra.mxu0 %v843_v38 }
  0x8c   :  { %845 = vmatprep.subr.bf16.mxu0 %v998_v53 }
  0x8e   :  { %281 = vmatmul.mubr.f32.gmra.mrb[26].mxu0 %v75_v41 }
  0x8f   :  { %286 = vmatprep.mubr.f32.mxu0 %v997_v0  ;;  %847 = vmatpush1.bf16.msra.mxu0 %v846_v42 }
  0x90   :  { %848 = vmatprep.subr.bf16.mxu0 %v998_v53 }
  0x92   :  { %287 = vmatmul.mubr.f32.gmra.mrb[28].mxu0 %v76_v43 }
  0x93   :  { %292 = vmatprep.mubr.f32.mxu0 %v997_v0  ;;  %850 = vmatpush1.bf16.msra.mxu0 %v849_v54 }
  0x94   :  { %851 = vmatprep.subr.bf16.mxu0 %v998_v53  ;;  %v89_v53 = vld [vmem:[#allocation2 + $0xd8] sm:$0xff] }
  0x96   :  { %293 = vmatmul.mubr.f32.gmra.mrb[30].mxu0 %v77_v44 }
  0x97   :  { %298 = vmatprep.mubr.f32.mxu0 %v997_v0  ;;  %853 = vmatpush1.bf16.msra.mxu0 %v852_v58 }
  0x9a   :  { %299 = vmatmul.mubr.f32.gmra.mrb[32].mxu0 %v78_v45 }
  0x9b   :  { %304 = vmatprep.mubr.f32.mxu0 %v997_v0 }
  0x9e   :  { %305 = vmatmul.mubr.f32.gmra.mrb[34].mxu0 %v79_v46 }
  0x9f   :  { %310 = vmatprep.mubr.f32.mxu0 %v997_v0 }
  0xa2   :  { %311 = vmatmul.mubr.f32.gmra.mrb[36].mxu0 %v80_v47 }
  0xa3   :  { %316 = vmatprep.mubr.f32.mxu0 %v997_v0 }
  0xa6   :  { %317 = vmatmul.mubr.f32.gmra.mrb[38].mxu0 %v81_v48 }
  0xa7   :  { %322 = vmatprep.mubr.f32.mxu0 %v997_v0 }
  0xaa   :  { %323 = vmatmul.mubr.f32.gmra.mrb[40].mxu0 %v82_v49 }
  0xab   :  { %328 = vmatprep.mubr.f32.mxu0 %v997_v0 }
  0xae   :  { %329 = vmatmul.mubr.f32.gmra.mrb[42].mxu0 %v83_v52 }
  0xaf   :  { %334 = vmatprep.mubr.f32.mxu0 %v997_v0 }
  0xb2   :  { %335 = vmatmul.mubr.f32.gmra.mrb[44].mxu0 %v84_v57 }
  0xb3   :  { %340 = vmatprep.mubr.f32.mxu0 %v997_v0 }
  0xb6   :  { %341 = vmatmul.mubr.f32.gmra.mrb[46].mxu0 %v85_v59 }
  0xb7   :  { %346 = vmatprep.mubr.f32.mxu0 %v997_v0 }
  0xba   :  { %347 = vmatmul.mubr.f32.gmra.mrb[48].mxu0 %v86_v60 }
  0xbb   :  { %352 = vmatprep.mubr.f32.mxu0 %v997_v0 }
  0xbe   :  { %353 = vmatmul.mubr.f32.gmra.mrb[50].mxu0 %v87_v61 }
  0xbf   :  { %358 = vmatprep.mubr.f32.mxu0 %v997_v0 }
  0xc2   :  { %359 = vmatmul.mubr.f32.gmra.mrb[52].mxu0 %v88_v62 }
  0xc3   :  { %364 = vmatprep.mubr.f32.mxu0 %v997_v0 }
  0xc6   :  { %365 = vmatmul.mubr.f32.gmra.mrb[54].mxu0 %v89_v53 }
  0xc7   :  { %370 = vmatprep.mubr.f32.mxu0 %v997_v0 }
  0xca   :  { %371 = vmatmul.mubr.f32.gmra.mrb[56].mxu0 %v90_v63 }
  0xcb   :  { %376 = vmatprep.mubr.f32.mxu0 %v997_v0 }
  0xce   :  { %377 = vmatmul.mubr.f32.gmra.mrb[58].mxu0 %v91_v1 }
  0xcf   :  { %382 = vmatprep.mubr.f32.mxu0 %v997_v0 }
  0xd2   :  { %383 = vmatmul.mubr.f32.gmra.mrb[60].mxu0 %v92_v2 }
  0xd3   :  { %388 = vmatprep.mubr.f32.mxu0 %v997_v0 }
  0xd6   :  { %389 = vmatmul.mubr.f32.gmra.mrb[62].mxu0 %v93_v3 }
 0x12d   :  { %v204_v11 = vpop.f32.mrb[0].mxu0 }
 0x12e   :  { %v205_v12 = vadd.f32 %v204_v11, %v1139_v9  ;;  %v206_v13 = vpop.f32.mrb[1].mxu0 }
 0x12f   :  { %v207_v0 = vadd.f32 %v206_v13, %v1141_v10 }
 0x130   :  { %v395_v16 = vmax.f32 %v205_v12, 0.0 }
 0x131   :  { %v396_v14 = vmax.f32 %v207_v0, 0.0  ;;  %v210_v15 = vpop.f32.mrb[2].mxu0 }
 0x132   :  { %v211_v17 = vadd.f32 %v210_v15, %v1139_v9  ;;  %v212_v18 = vpop.f32.mrb[3].mxu0 }
 0x133   :  { %v213_v19 = vadd.f32 %v212_v18, %v1141_v10  ;;  %562 = vmatprep.mubr.f32.mxu0 %v396_v14 }
 0x134   :  { %563 = vmatmul.mubr.f32.vlgmr.msra.gmra.mrb[64].mxu0 %v395_v16  ;;  %v397_v22 = vmax.f32 %v211_v17, 0.0 }
 0x135   :  { %v398_v20 = vmax.f32 %v213_v19, 0.0  ;;  %v216_v21 = vpop.f32.mrb[4].mxu0 }
 0x136   :  { %v217_v23 = vadd.f32 %v216_v21, %v1139_v9  ;;  %v218_v24 = vpop.f32.mrb[5].mxu0 }
 0x137   :  { %v219_v25 = vadd.f32 %v218_v24, %v1141_v10  ;;  %567 = vmatprep.mubr.f32.mxu0 %v398_v20 }
 0x138   :  { %568 = vmatmul.mubr.f32.gmra.mrb[66].mxu0 %v397_v22  ;;  %v399_v28 = vmax.f32 %v217_v23, 0.0 }
 0x139   :  { %v400_v26 = vmax.f32 %v219_v25, 0.0  ;;  %v222_v27 = vpop.f32.mrb[6].mxu0 }
 0x13a   :  { %v223_v29 = vadd.f32 %v222_v27, %v1139_v9  ;;  %v224_v30 = vpop.f32.mrb[7].mxu0 }
 0x13b   :  { %v225_v31 = vadd.f32 %v224_v30, %v1141_v10  ;;  %572 = vmatprep.mubr.f32.mxu0 %v400_v26 }
 0x13c   :  { %573 = vmatmul.mubr.f32.gmra.mrb[68].mxu0 %v399_v28  ;;  %v401_v34 = vmax.f32 %v223_v29, 0.0 }
 0x13d   :  { %v402_v32 = vmax.f32 %v225_v31, 0.0  ;;  %v228_v33 = vpop.f32.mrb[8].mxu0 }
 0x13e   :  { %v229_v35 = vadd.f32 %v228_v33, %v1139_v9  ;;  %v230_v36 = vpop.f32.mrb[9].mxu0 }
 0x13f   :  { %577 = vmatprep.mubr.f32.mxu0 %v402_v32  ;;  %v231_v37 = vadd.f32 %v230_v36, %v1141_v10 }
 0x140   :  { %578 = vmatmul.mubr.f32.gmra.mrb[70].mxu0 %v401_v34  ;;  %v403_v40 = vmax.f32 %v229_v35, 0.0 }
 0x141   :  { %v234_v38 = vpop.f32.mrb[10].mxu0  ;;  %v404_v39 = vmax.f32 %v231_v37, 0.0 }
 0x142   :  { %v235_v41 = vadd.f32 %v234_v38, %v1139_v9  ;;  %v236_v42 = vpop.f32.mrb[11].mxu0 }
 0x143   :  { %v237_v43 = vadd.f32 %v236_v42, %v1141_v10  ;;  %582 = vmatprep.mubr.f32.mxu1 %v404_v39 }
 0x144   :  { %583 = vmatmul.mubr.f32.vlgmr.msra.gmra.mrb[0].mxu1 %v403_v40  ;;  %v405_v46 = vmax.f32 %v235_v41, 0.0 }
 0x145   :  { %v406_v44 = vmax.f32 %v237_v43, 0.0  ;;  %v240_v45 = vpop.f32.mrb[12].mxu0 }
 0x146   :  { %v241_v47 = vadd.f32 %v240_v45, %v1139_v9  ;;  %v242_v48 = vpop.f32.mrb[13].mxu0 }
 0x147   :  { %v243_v49 = vadd.f32 %v242_v48, %v1141_v10  ;;  %587 = vmatprep.mubr.f32.mxu1 %v406_v44 }
 0x148   :  { %588 = vmatmul.mubr.f32.gmra.mrb[2].mxu1 %v405_v46  ;;  %v407_v52 = vmax.f32 %v241_v47, 0.0 }
 0x149   :  { %v408_v50 = vmax.f32 %v243_v49, 0.0  ;;  %v246_v51 = vpop.f32.mrb[14].mxu0 }
 0x14a   :  { %v247_v54 = vadd.f32 %v246_v51, %v1139_v9  ;;  %v248_v55 = vpop.f32.mrb[15].mxu0 }
 0x14b   :  { %v249_v56 = vadd.f32 %v248_v55, %v1141_v10  ;;  %592 = vmatprep.mubr.f32.mxu1 %v408_v50 }
 0x14c   :  { %593 = vmatmul.mubr.f32.gmra.mrb[4].mxu1 %v407_v52  ;;  %v409_v59 = vmax.f32 %v247_v54, 0.0 }
 0x14d   :  { %v410_v57 = vmax.f32 %v249_v56, 0.0  ;;  %v252_v58 = vpop.f32.mrb[16].mxu0 }
 0x14e   :  { %v253_v60 = vadd.f32 %v252_v58, %v1139_v9  ;;  %v254_v61 = vpop.f32.mrb[17].mxu0 }
 0x14f   :  { %v255_v62 = vadd.f32 %v254_v61, %v1141_v10  ;;  %597 = vmatprep.mubr.f32.mxu1 %v410_v57 }
 0x150   :  { %598 = vmatmul.mubr.f32.gmra.mrb[6].mxu1 %v409_v59  ;;  %v411_v1 = vmax.f32 %v253_v60, 0.0 }
 0x151   :  { %v412_v53 = vmax.f32 %v255_v62, 0.0  ;;  %v258_v63 = vpop.f32.mrb[18].mxu0 }
 0x152   :  { %v259_v2 = vadd.f32 %v258_v63, %v1139_v9  ;;  %v260_v3 = vpop.f32.mrb[19].mxu0 }
 0x153   :  { %v261_v4 = vadd.f32 %v260_v3, %v1141_v10  ;;  %602 = vmatprep.mubr.f32.mxu1 %v412_v53 }
 0x154   :  { %603 = vmatmul.mubr.f32.gmra.mrb[8].mxu1 %v411_v1  ;;  %v413_v7 = vmax.f32 %v259_v2, 0.0 }
 0x155   :  { %v414_v5 = vmax.f32 %v261_v4, 0.0  ;;  %v264_v6 = vpop.f32.mrb[20].mxu0 }
 0x156   :  { %v265_v8 = vadd.f32 %v264_v6, %v1139_v9  ;;  %v266_v11 = vpop.f32.mrb[21].mxu0 }
 0x157   :  { %v267_v12 = vadd.f32 %v266_v11, %v1141_v10  ;;  %607 = vmatprep.mubr.f32.mxu1 %v414_v5 }
 0x158   :  { %608 = vmatmul.mubr.f32.gmra.mrb[10].mxu1 %v413_v7  ;;  %v415_v14 = vmax.f32 %v265_v8, 0.0 }
 0x159   :  { %v416_v13 = vmax.f32 %v267_v12, 0.0  ;;  %v270_v0 = vpop.f32.mrb[22].mxu0 }
 0x15a   :  { %v271_v15 = vadd.f32 %v270_v0, %v1139_v9  ;;  %v272_v16 = vpop.f32.mrb[23].mxu0 }
 0x15b   :  { %v273_v17 = vadd.f32 %v272_v16, %v1141_v10  ;;  %612 = vmatprep.mubr.f32.mxu1 %v416_v13 }
 0x15c   :  { %613 = vmatmul.mubr.f32.gmra.mrb[12].mxu1 %v415_v14  ;;  %v417_v20 = vmax.f32 %v271_v15, 0.0 }
 0x15d   :  { %v418_v18 = vmax.f32 %v273_v17, 0.0  ;;  %v276_v19 = vpop.f32.mrb[24].mxu0 }
 0x15e   :  { %v277_v21 = vadd.f32 %v276_v19, %v1139_v9  ;;  %v278_v22 = vpop.f32.mrb[25].mxu0 }
 0x15f   :  { %v279_v23 = vadd.f32 %v278_v22, %v1141_v10  ;;  %617 = vmatprep.mubr.f32.mxu1 %v418_v18 }
 0x160   :  { %618 = vmatmul.mubr.f32.gmra.mrb[14].mxu1 %v417_v20  ;;  %v419_v26 = vmax.f32 %v277_v21, 0.0 }
 0x161   :  { %v420_v24 = vmax.f32 %v279_v23, 0.0  ;;  %v282_v25 = vpop.f32.mrb[26].mxu0 }
 0x162   :  { %v283_v27 = vadd.f32 %v282_v25, %v1139_v9  ;;  %v284_v28 = vpop.f32.mrb[27].mxu0 }
 0x163   :  { %v285_v29 = vadd.f32 %v284_v28, %v1141_v10  ;;  %622 = vmatprep.mubr.f32.mxu1 %v420_v24 }
 0x164   :  { %623 = vmatmul.mubr.f32.gmra.mrb[16].mxu1 %v419_v26  ;;  %v421_v32 = vmax.f32 %v283_v27, 0.0 }
 0x165   :  { %v422_v30 = vmax.f32 %v285_v29, 0.0  ;;  %v288_v31 = vpop.f32.mrb[28].mxu0 }
 0x166   :  { %v289_v33 = vadd.f32 %v288_v31, %v1139_v9  ;;  %v290_v34 = vpop.f32.mrb[29].mxu0 }
 0x167   :  { %v291_v35 = vadd.f32 %v290_v34, %v1141_v10  ;;  %627 = vmatprep.mubr.f32.mxu1 %v422_v30 }
 0x168   :  { %628 = vmatmul.mubr.f32.gmra.mrb[18].mxu1 %v421_v32  ;;  %v423_v38 = vmax.f32 %v289_v33, 0.0 }
 0x169   :  { %v424_v36 = vmax.f32 %v291_v35, 0.0  ;;  %v294_v37 = vpop.f32.mrb[30].mxu0 }
 0x16a   :  { %v295_v39 = vadd.f32 %v294_v37, %v1139_v9  ;;  %v296_v40 = vpop.f32.mrb[31].mxu0 }
 0x16b   :  { %v297_v41 = vadd.f32 %v296_v40, %v1141_v10  ;;  %632 = vmatprep.mubr.f32.mxu1 %v424_v36 }
 0x16c   :  { %633 = vmatmul.mubr.f32.gmra.mrb[20].mxu1 %v423_v38  ;;  %v425_v44 = vmax.f32 %v295_v39, 0.0 }
 0x16d   :  { %v426_v42 = vmax.f32 %v297_v41, 0.0  ;;  %v300_v43 = vpop.f32.mrb[32].mxu0 }
 0x16e   :  { %v301_v45 = vadd.f32 %v300_v43, %v1139_v9  ;;  %v302_v46 = vpop.f32.mrb[33].mxu0 }
 0x16f   :  { %v303_v47 = vadd.f32 %v302_v46, %v1141_v10  ;;  %637 = vmatprep.mubr.f32.mxu1 %v426_v42 }
 0x170   :  { %638 = vmatmul.mubr.f32.gmra.mrb[22].mxu1 %v425_v44  ;;  %v427_v50 = vmax.f32 %v301_v45, 0.0 }
 0x171   :  { %v428_v48 = vmax.f32 %v303_v47, 0.0  ;;  %v306_v49 = vpop.f32.mrb[34].mxu0 }
 0x172   :  { %v307_v51 = vadd.f32 %v306_v49, %v1139_v9  ;;  %v308_v52 = vpop.f32.mrb[35].mxu0 }
 0x173   :  { %v309_v54 = vadd.f32 %v308_v52, %v1141_v10  ;;  %642 = vmatprep.mubr.f32.mxu1 %v428_v48 }
 0x174   :  { %643 = vmatmul.mubr.f32.gmra.mrb[24].mxu1 %v427_v50  ;;  %v429_v57 = vmax.f32 %v307_v51, 0.0 }
 0x175   :  { %v430_v55 = vmax.f32 %v309_v54, 0.0  ;;  %v312_v56 = vpop.f32.mrb[36].mxu0 }
 0x176   :  { %v313_v58 = vadd.f32 %v312_v56, %v1139_v9  ;;  %v314_v59 = vpop.f32.mrb[37].mxu0 }
 0x177   :  { %v315_v60 = vadd.f32 %v314_v59, %v1141_v10  ;;  %647 = vmatprep.mubr.f32.mxu1 %v430_v55 }
 0x178   :  { %648 = vmatmul.mubr.f32.gmra.mrb[26].mxu1 %v429_v57  ;;  %v431_v53 = vmax.f32 %v313_v58, 0.0 }
 0x179   :  { %v432_v61 = vmax.f32 %v315_v60, 0.0  ;;  %v318_v62 = vpop.f32.mrb[38].mxu0 }
 0x17a   :  { %v319_v63 = vadd.f32 %v318_v62, %v1139_v9  ;;  %v320_v1 = vpop.f32.mrb[39].mxu0 }
 0x17b   :  { %v321_v2 = vadd.f32 %v320_v1, %v1141_v10  ;;  %652 = vmatprep.mubr.f32.mxu1 %v432_v61 }
 0x17c   :  { %653 = vmatmul.mubr.f32.gmra.mrb[28].mxu1 %v431_v53  ;;  %v433_v5 = vmax.f32 %v319_v63, 0.0 }
 0x17d   :  { %v434_v3 = vmax.f32 %v321_v2, 0.0  ;;  %v324_v4 = vpop.f32.mrb[40].mxu0 }
 0x17e   :  { %v325_v6 = vadd.f32 %v324_v4, %v1139_v9  ;;  %v326_v7 = vpop.f32.mrb[41].mxu0 }
 0x17f   :  { %v327_v8 = vadd.f32 %v326_v7, %v1141_v10  ;;  %657 = vmatprep.mubr.f32.mxu1 %v434_v3 }
 0x180   :  { %658 = vmatmul.mubr.f32.gmra.mrb[30].mxu1 %v433_v5  ;;  %v435_v13 = vmax.f32 %v325_v6, 0.0 }
 0x181   :  { %v436_v11 = vmax.f32 %v327_v8, 0.0  ;;  %v330_v12 = vpop.f32.mrb[42].mxu0 }
 0x182   :  { %v331_v0 = vadd.f32 %v330_v12, %v1139_v9  ;;  %v332_v14 = vpop.f32.mrb[43].mxu0 }
 0x183   :  { %v333_v15 = vadd.f32 %v332_v14, %v1141_v10  ;;  %662 = vmatprep.mubr.f32.mxu1 %v436_v11 }
 0x184   :  { %663 = vmatmul.mubr.f32.gmra.mrb[32].mxu1 %v435_v13  ;;  %v437_v18 = vmax.f32 %v331_v0, 0.0 }
 0x185   :  { %v438_v16 = vmax.f32 %v333_v15, 0.0  ;;  %v336_v17 = vpop.f32.mrb[44].mxu0 }
 0x186   :  { %v337_v19 = vadd.f32 %v336_v17, %v1139_v9  ;;  %v338_v20 = vpop.f32.mrb[45].mxu0 }
 0x187   :  { %v339_v21 = vadd.f32 %v338_v20, %v1141_v10  ;;  %667 = vmatprep.mubr.f32.mxu1 %v438_v16  ;;  %v1210_v16 = vld [vmem:[%s1263_s4] ss:$0 sm:$0xff]  ;;  %s999_s4 = smov [#allocation8]  }
 0x188   :  { %668 = vmatmul.mubr.f32.gmra.mrb[34].mxu1 %v437_v18  ;;  %v439_v24 = vmax.f32 %v337_v19, 0.0  ;;  %s760_s8 = sshll.u32 %s999_s4, 4  ;;  %s761_s8 = int_to_ptr.vmem [resolvable:$true] %s760_s8 }
 0x189   :  { %v440_v22 = vmax.f32 %v339_v21, 0.0  ;;  %v342_v23 = vpop.f32.mrb[46].mxu0  ;;  %s962_s9 = scalar_lea.vmem %s761_s8, 4096  ;;  %p967_p11 = scmp.lt.s32.totalorder %s761_s8, %s761_s8 }
 0x18a   :  { %v343_v25 = vadd.f32 %v342_v23, %v1139_v9  ;;  %v344_v26 = vpop.f32.mrb[47].mxu0  ;;  %p963_p10 = scmp.ne.s32.totalorder %s761_s8, %s962_s9  ;;  %p968_p12 = scmp.lt.s32.totalorder %s962_s9, %s962_s9 }
 0x18b   :  { %v345_v27 = vadd.f32 %v344_v26, %v1141_v10  ;;  %672 = vmatprep.mubr.f32.mxu1 %v440_v22 }
 0x18c   :  { %673 = vmatmul.mubr.f32.gmra.mrb[36].mxu1 %v439_v24  ;;  %v441_v30 = vmax.f32 %v343_v25, 0.0  ;;  %p969_p13 = por %p968_p12, %p967_p11 }
 0x18d   :  { %v442_v28 = vmax.f32 %v345_v27, 0.0  ;;  %v348_v29 = vpop.f32.mrb[48].mxu0 }
 0x18e   :  { %v349_v31 = vadd.f32 %v348_v29, %v1139_v9  ;;  %v350_v32 = vpop.f32.mrb[49].mxu0  ;;  %p970_p0 = pnand %p969_p13, %p963_p10 }
 0x18f   :  { %v351_v33 = vadd.f32 %v350_v32, %v1141_v10  ;;  %677 = vmatprep.mubr.f32.mxu1 %v442_v28 }
 0x190   :  { %678 = vmatmul.mubr.f32.gmra.mrb[38].mxu1 %v441_v30  ;;  %v443_v36 = vmax.f32 %v349_v31, 0.0 }
 0x191   :  { %v444_v34 = vmax.f32 %v351_v33, 0.0  ;;  %v354_v35 = vpop.f32.mrb[50].mxu0 }
 0x192   :  { %v355_v37 = vadd.f32 %v354_v35, %v1139_v9  ;;  %v356_v38 = vpop.f32.mrb[51].mxu0 }
 0x193   :  { %v357_v39 = vadd.f32 %v356_v38, %v1141_v10  ;;  %682 = vmatprep.mubr.f32.mxu1 %v444_v34 }
 0x194   :  { %683 = vmatmul.mubr.f32.gmra.mrb[40].mxu1 %v443_v36  ;;  %v445_v42 = vmax.f32 %v355_v37, 0.0 }
 0x195   :  { %v446_v40 = vmax.f32 %v357_v39, 0.0  ;;  %v360_v41 = vpop.f32.mrb[52].mxu0 }
 0x196   :  { %v361_v43 = vadd.f32 %v360_v41, %v1139_v9  ;;  %v362_v44 = vpop.f32.mrb[53].mxu0 }
 0x197   :  { %v363_v45 = vadd.f32 %v362_v44, %v1141_v10  ;;  %687 = vmatprep.mubr.f32.mxu1 %v446_v40 }
 0x198   :  { %688 = vmatmul.mubr.f32.gmra.mrb[42].mxu1 %v445_v42  ;;  %v447_v48 = vmax.f32 %v361_v43, 0.0 }
 0x199   :  { %v448_v46 = vmax.f32 %v363_v45, 0.0  ;;  %v366_v47 = vpop.f32.mrb[54].mxu0 }
 0x19a   :  { %v367_v49 = vadd.f32 %v366_v47, %v1139_v9  ;;  %v368_v50 = vpop.f32.mrb[55].mxu0 }
 0x19b   :  { %v369_v51 = vadd.f32 %v368_v50, %v1141_v10  ;;  %692 = vmatprep.mubr.f32.mxu1 %v448_v46 }
 0x19c   :  { %693 = vmatmul.mubr.f32.gmra.mrb[44].mxu1 %v447_v48  ;;  %v449_v55 = vmax.f32 %v367_v49, 0.0 }
 0x19d   :  { %v450_v52 = vmax.f32 %v369_v51, 0.0  ;;  %v372_v54 = vpop.f32.mrb[56].mxu0 }
 0x19e   :  { %v373_v56 = vadd.f32 %v372_v54, %v1139_v9  ;;  %v374_v57 = vpop.f32.mrb[57].mxu0 }
 0x19f   :  { %v375_v58 = vadd.f32 %v374_v57, %v1141_v10  ;;  %697 = vmatprep.mubr.f32.mxu1 %v450_v52 }
 0x1a0   :  { %698 = vmatmul.mubr.f32.gmra.mrb[46].mxu1 %v449_v55  ;;  %v451_v61 = vmax.f32 %v373_v56, 0.0 }
 0x1a1   :  { %v452_v59 = vmax.f32 %v375_v58, 0.0  ;;  %v378_v60 = vpop.f32.mrb[58].mxu0 }
 0x1a2   :  { %v379_v62 = vadd.f32 %v378_v60, %v1139_v9  ;;  %v380_v53 = vpop.f32.mrb[59].mxu0 }
 0x1a3   :  { %v381_v63 = vadd.f32 %v380_v53, %v1141_v10  ;;  %702 = vmatprep.mubr.f32.mxu1 %v452_v59 }
 0x1a4   :  { %703 = vmatmul.mubr.f32.gmra.mrb[48].mxu1 %v451_v61  ;;  %v453_v3 = vmax.f32 %v379_v62, 0.0 }
 0x1a5   :  { %v454_v1 = vmax.f32 %v381_v63, 0.0  ;;  %v384_v2 = vpop.f32.mrb[60].mxu0 }
 0x1a6   :  { %v385_v4 = vadd.f32 %v384_v2, %v1139_v9  ;;  %v386_v5 = vpop.f32.mrb[61].mxu0 }
 0x1a7   :  { %v387_v6 = vadd.f32 %v386_v5, %v1141_v10  ;;  %707 = vmatprep.mubr.f32.mxu1 %v454_v1 }
 0x1a8   :  { %708 = vmatmul.mubr.f32.gmra.mrb[50].mxu1 %v453_v3  ;;  %v455_v11 = vmax.f32 %v385_v4, 0.0 }
 0x1a9   :  { %v456_v7 = vmax.f32 %v387_v6, 0.0  ;;  %v390_v8 = vpop.f32.mrb[62].mxu0 }
 0x1aa   :  { %v391_v12 = vadd.f32 %v390_v8, %v1139_v9  ;;  %v392_v13 = vpop.f32.mrb[63].mxu0 }
 0x1ab   :  { %v393_v0 = vadd.f32 %v392_v13, %v1141_v10  ;;  %712 = vmatprep.mubr.f32.mxu1 %v456_v7 }
 0x1ac   :  { %713 = vmatmul.mubr.f32.gmra.mrb[52].mxu1 %v455_v11  ;;  %v457_v15 = vmax.f32 %v391_v12, 0.0 }
 0x1ad   :  { %v458_v14 = vmax.f32 %v393_v0, 0.0 }
 0x1af   :  { %717 = vmatprep.mubr.f32.mxu1 %v458_v14 }
 0x1b0   :  { %718 = vmatmul.mubr.f32.gmra.mrb[54].mxu1 %v457_v15 }
 0x207   :  { %v564_v17 = vpop.f32.mrb[64].mxu0 }
 0x208   :  { %v565_v18 = vadd.f32 %v1210_v16, %v564_v17  ;;  %v566_v19 = vpop.f32.mrb[65].mxu0 }
 0x20a   :  { %723 = vst [vmem:[#allocation8] sm:$0xff] %v565_v18 }
 0x20b   :  { %v569_v9 = vpop.f32.mrb[66].mxu0 }
 0x20c   :  { %v570_v20 = vadd.f32 %v1210_v16, %v569_v9  ;;  %v571_v10 = vpop.f32.mrb[67].mxu0 }
 0x20e   :  { %724 = vst [vmem:[#allocation8 + $0x8] sm:$0xff] %v570_v20 }
 0x20f   :  { %v574_v21 = vpop.f32.mrb[68].mxu0 }
 0x210   :  { %v575_v22 = vadd.f32 %v1210_v16, %v574_v21  ;;  %v576_v23 = vpop.f32.mrb[69].mxu0 }
 0x212   :  { %725 = vst [vmem:[#allocation8 + $0x10] sm:$0xff] %v575_v22 }
 0x213   :  { %v579_v24 = vpop.f32.mrb[70].mxu0 }
 0x214   :  { %v580_v25 = vadd.f32 %v1210_v16, %v579_v24  ;;  %v581_v26 = vpop.f32.mrb[71].mxu0 }
 0x216   :  { %726 = vst [vmem:[#allocation8 + $0x18] sm:$0xff] %v580_v25 }
 0x217   :  { %v584_v27 = vpop.f32.mrb[0].mxu1 }
 0x218   :  { %v585_v28 = vadd.f32 %v1210_v16, %v584_v27  ;;  %v586_v29 = vpop.f32.mrb[1].mxu1 }
 0x21a   :  { %727 = vst [vmem:[#allocation8 + $0x20] sm:$0xff] %v585_v28 }
 0x21b   :  { %v589_v30 = vpop.f32.mrb[2].mxu1 }
 0x21c   :  { %v590_v31 = vadd.f32 %v1210_v16, %v589_v30  ;;  %v591_v32 = vpop.f32.mrb[3].mxu1 }
 0x21e   :  { %728 = vst [vmem:[#allocation8 + $0x28] sm:$0xff] %v590_v31 }
 0x21f   :  { %v594_v33 = vpop.f32.mrb[4].mxu1 }
 0x220   :  { %v595_v34 = vadd.f32 %v1210_v16, %v594_v33  ;;  %v596_v35 = vpop.f32.mrb[5].mxu1 }
 0x222   :  { %729 = vst [vmem:[#allocation8 + $0x30] sm:$0xff] %v595_v34 }
 0x223   :  { %v599_v36 = vpop.f32.mrb[6].mxu1 }
 0x224   :  { %v600_v37 = vadd.f32 %v1210_v16, %v599_v36  ;;  %v601_v38 = vpop.f32.mrb[7].mxu1 }
 0x226   :  { %730 = vst [vmem:[#allocation8 + $0x38] sm:$0xff] %v600_v37 }
 0x227   :  { %v604_v39 = vpop.f32.mrb[8].mxu1 }
 0x228   :  { %v605_v40 = vadd.f32 %v1210_v16, %v604_v39  ;;  %v606_v41 = vpop.f32.mrb[9].mxu1 }
 0x22a   :  { %731 = vst [vmem:[#allocation8 + $0x40] sm:$0xff] %v605_v40 }
 0x22b   :  { %v609_v42 = vpop.f32.mrb[10].mxu1 }
 0x22c   :  { %v610_v43 = vadd.f32 %v1210_v16, %v609_v42  ;;  %v611_v44 = vpop.f32.mrb[11].mxu1 }
 0x22e   :  { %732 = vst [vmem:[#allocation8 + $0x48] sm:$0xff] %v610_v43 }
 0x22f   :  { %v614_v45 = vpop.f32.mrb[12].mxu1 }
 0x230   :  { %v615_v46 = vadd.f32 %v1210_v16, %v614_v45  ;;  %v616_v47 = vpop.f32.mrb[13].mxu1 }
 0x232   :  { %733 = vst [vmem:[#allocation8 + $0x50] sm:$0xff] %v615_v46 }
 0x233   :  { %v619_v48 = vpop.f32.mrb[14].mxu1 }
 0x234   :  { %v620_v49 = vadd.f32 %v1210_v16, %v619_v48  ;;  %v621_v50 = vpop.f32.mrb[15].mxu1 }
 0x236   :  { %734 = vst [vmem:[#allocation8 + $0x58] sm:$0xff] %v620_v49 }
 0x237   :  { %v624_v51 = vpop.f32.mrb[16].mxu1 }
 0x238   :  { %v625_v52 = vadd.f32 %v1210_v16, %v624_v51  ;;  %v626_v54 = vpop.f32.mrb[17].mxu1 }
 0x23a   :  { %735 = vst [vmem:[#allocation8 + $0x60] sm:$0xff] %v625_v52 }
 0x23b   :  { %v629_v55 = vpop.f32.mrb[18].mxu1 }
 0x23c   :  { %v630_v56 = vadd.f32 %v1210_v16, %v629_v55  ;;  %v631_v57 = vpop.f32.mrb[19].mxu1 }
 0x23e   :  { %736 = vst [vmem:[#allocation8 + $0x68] sm:$0xff] %v630_v56 }
 0x23f   :  { %v634_v58 = vpop.f32.mrb[20].mxu1 }
 0x240   :  { %v635_v59 = vadd.f32 %v1210_v16, %v634_v58  ;;  %v636_v60 = vpop.f32.mrb[21].mxu1 }
 0x242   :  { %737 = vst [vmem:[#allocation8 + $0x70] sm:$0xff] %v635_v59 }
 0x243   :  { %v639_v61 = vpop.f32.mrb[22].mxu1 }
 0x244   :  { %v640_v62 = vadd.f32 %v1210_v16, %v639_v61  ;;  %v641_v53 = vpop.f32.mrb[23].mxu1 }
 0x246   :  { %738 = vst [vmem:[#allocation8 + $0x78] sm:$0xff] %v640_v62 }
 0x247   :  { %v644_v63 = vpop.f32.mrb[24].mxu1 }
 0x248   :  { %v645_v1 = vadd.f32 %v1210_v16, %v644_v63  ;;  %v646_v2 = vpop.f32.mrb[25].mxu1 }
 0x24a   :  { %739 = vst [vmem:[#allocation8 + $0x80] sm:$0xff] %v645_v1 }
 0x24b   :  { %v649_v3 = vpop.f32.mrb[26].mxu1 }
 0x24c   :  { %v650_v4 = vadd.f32 %v1210_v16, %v649_v3  ;;  %v651_v5 = vpop.f32.mrb[27].mxu1 }
 0x24e   :  { %740 = vst [vmem:[#allocation8 + $0x88] sm:$0xff] %v650_v4 }
 0x24f   :  { %v654_v6 = vpop.f32.mrb[28].mxu1 }
 0x250   :  { %v655_v7 = vadd.f32 %v1210_v16, %v654_v6  ;;  %v656_v8 = vpop.f32.mrb[29].mxu1 }
 0x252   :  { %741 = vst [vmem:[#allocation8 + $0x90] sm:$0xff] %v655_v7 }
 0x253   :  { %v659_v11 = vpop.f32.mrb[30].mxu1 }
 0x254   :  { %v660_v12 = vadd.f32 %v1210_v16, %v659_v11  ;;  %v661_v13 = vpop.f32.mrb[31].mxu1 }
 0x256   :  { %742 = vst [vmem:[#allocation8 + $0x98] sm:$0xff] %v660_v12 }
 0x257   :  { %v664_v0 = vpop.f32.mrb[32].mxu1 }
 0x258   :  { %v665_v14 = vadd.f32 %v1210_v16, %v664_v0  ;;  %v666_v15 = vpop.f32.mrb[33].mxu1 }
 0x25a   :  { %743 = vst [vmem:[#allocation8 + $0xa0] sm:$0xff] %v665_v14 }
 0x25b   :  { %v669_v17 = vpop.f32.mrb[34].mxu1 }
 0x25c   :  { %v670_v18 = vadd.f32 %v1210_v16, %v669_v17  ;;  %v671_v19 = vpop.f32.mrb[35].mxu1 }
 0x25e   :  { %744 = vst [vmem:[#allocation8 + $0xa8] sm:$0xff] %v670_v18 }
 0x25f   :  { %v674_v9 = vpop.f32.mrb[36].mxu1 }
 0x260   :  { %v675_v20 = vadd.f32 %v1210_v16, %v674_v9  ;;  %v676_v10 = vpop.f32.mrb[37].mxu1 }
 0x262   :  { %745 = vst [vmem:[#allocation8 + $0xb0] sm:$0xff] %v675_v20 }
 0x263   :  { %v679_v21 = vpop.f32.mrb[38].mxu1 }
 0x264   :  { %v680_v22 = vadd.f32 %v1210_v16, %v679_v21  ;;  %v681_v23 = vpop.f32.mrb[39].mxu1 }
 0x266   :  { %746 = vst [vmem:[#allocation8 + $0xb8] sm:$0xff] %v680_v22 }
 0x267   :  { %v684_v24 = vpop.f32.mrb[40].mxu1 }
 0x268   :  { %v685_v25 = vadd.f32 %v1210_v16, %v684_v24  ;;  %v686_v26 = vpop.f32.mrb[41].mxu1 }
 0x26a   :  { %747 = vst [vmem:[#allocation8 + $0xc0] sm:$0xff] %v685_v25 }
 0x26b   :  { %v689_v27 = vpop.f32.mrb[42].mxu1 }
 0x26c   :  { %v690_v28 = vadd.f32 %v1210_v16, %v689_v27  ;;  %v691_v29 = vpop.f32.mrb[43].mxu1 }
 0x26e   :  { %748 = vst [vmem:[#allocation8 + $0xc8] sm:$0xff] %v690_v28 }
 0x26f   :  { %v694_v30 = vpop.f32.mrb[44].mxu1 }
 0x270   :  { %v695_v31 = vadd.f32 %v1210_v16, %v694_v30  ;;  %v696_v32 = vpop.f32.mrb[45].mxu1 }
 0x272   :  { %749 = vst [vmem:[#allocation8 + $0xd0] sm:$0xff] %v695_v31 }
 0x273   :  { %v699_v33 = vpop.f32.mrb[46].mxu1 }
 0x274   :  { %v700_v34 = vadd.f32 %v1210_v16, %v699_v33  ;;  %v701_v35 = vpop.f32.mrb[47].mxu1 }
 0x276   :  { %750 = vst [vmem:[#allocation8 + $0xd8] sm:$0xff] %v700_v34 }
 0x277   :  { %v704_v36 = vpop.f32.mrb[48].mxu1 }
 0x278   :  { %v705_v37 = vadd.f32 %v1210_v16, %v704_v36  ;;  %v706_v38 = vpop.f32.mrb[49].mxu1 }
 0x27a   :  { %751 = vst [vmem:[#allocation8 + $0xe0] sm:$0xff] %v705_v37 }
 0x27b   :  { %v709_v39 = vpop.f32.mrb[50].mxu1 }
 0x27c   :  { %v710_v40 = vadd.f32 %v1210_v16, %v709_v39  ;;  %v711_v41 = vpop.f32.mrb[51].mxu1 }
 0x27e   :  { %752 = vst [vmem:[#allocation8 + $0xe8] sm:$0xff] %v710_v40 }
 0x27f   :  { %v714_v42 = vpop.f32.mrb[52].mxu1 }
 0x280   :  { %v715_v43 = vadd.f32 %v1210_v16, %v714_v42  ;;  %v716_v44 = vpop.f32.mrb[53].mxu1 }
 0x282   :  { %753 = vst [vmem:[#allocation8 + $0xf0] sm:$0xff] %v715_v43 }
 0x283   :  { %v719_v45 = vpop.f32.mrb[54].mxu1 }
 0x284   :  { %v720_v46 = vadd.f32 %v1210_v16, %v719_v45  ;;  %v721_v47 = vpop.f32.mrb[55].mxu1 }
 0x286   :  { %754 = vst [vmem:[#allocation8 + $0xf8] sm:$0xff] %v720_v46 }
 0x287   :  { %973 = shalt.err (!%p970_p0)
}
 0x288   :  { %s974_s12 = scalar_lea.hbm %s1264_s5, 4096 }
 0x289   :  { %p975_p1 = scmp.ne.s32.totalorder %s1264_s5, %s974_s12  ;;  %p978_p2 = scmp.lt.u32.totalorder %s974_s12, %s1264_s5 }
 0x28b   :  { %p980_p3 = pnand %p978_p2, %p975_p1 }
 0x28d   :  { %983 = shalt.err (!%p980_p3)
}
 0x28e   :  { %766 = dma.vmem_to_hbm [thread:$0]  %s761_s8, 4096, %s1264_s5, [#allocation4], %s994_s1, %s994_s1, %s995_s17  }
 0x28f   :  { %988 = dma.done.wait [#allocation4], 4096  }
 0x290   :  { %989 = vsyncadd [#allocation4], 4294963200 }
 0x291   :  { %770 = vsyncpa [#allocation3], 1 }
 0x292   :  { %771 = vsyncpa [#allocation6], 1 }
 0x293   :  { %772 = vsyncpa [#allocation4], 1 }

// kernel: tpu_custom_call.1
= control target key start
LH: loop header
LB: loop body
LE: loop exit
PB: predicated region body
PF: predicated region fallthrough
CT: control target
= control target key end

     0   :  { %10 = vsyncpa [#allocation3], 0  ;;  %s1259_s0 = inlined_call_operand.hbm [shape: f32[256,128], index: 0, kind: input, shape index: {}]   ;;  %s1260_s1 = inlined_call_operand.hbm [shape: f32[128,256], index: 1, kind: input, shape index: {}]   ;;  %s1261_s2 = inlined_call_operand.vmem [shape: f32[1,256], index: 2, kind: input, shape index: {}]   ;;  %s1262_s3 = inlined_call_operand.hbm [shape: f32[256,128], index: 3, kind: input, shape index: {}]   ;;  %s1263_s4 = inlined_call_operand.vmem [shape: f32[1,128], index: 4, kind: input, shape index: {}]   ;;  %s1264_s5 = inlined_call_operand.hbm [shape: f32[256,128], index: 5, kind: output, shape index: {}]  }
   0x1   :  { %11 = vsyncpa [#allocation6], 0 }
   0x2   :  { %12 = vsyncpa [#allocation4], 0  ;;  %s990_s18 = smov [#allocation5]   ;;  %s896_s22 = scalar_lea.hbm %s1260_s1, 4096 }
   0x3   :  { %s30_s19 = sshll.u32 %s990_s18, 4  ;;  %p897_p0 = scmp.ne.s32.totalorder %s1260_s1, %s896_s22  ;;  %s31_s19 = int_to_ptr.vmem [resolvable:$true] %s30_s19 }
   0x4   :  { %p900_p1 = scmp.lt.u32.totalorder %s896_s22, %s1260_s1 }
   0x6   :  { %p902_p2 = pnand %p900_p1, %p897_p0 }
   0x8   :  { %905 = shalt.err (!%p902_p2)
}
   0x9   :  { %s906_s27 = scalar_lea.vmem %s31_s19, 4096  ;;  %p911_p4 = scmp.lt.s32.totalorder %s31_s19, %s31_s19 }
   0xa   :  { %p907_p3 = scmp.ne.s32.totalorder %s31_s19, %s906_s27  ;;  %p912_p5 = scmp.lt.s32.totalorder %s906_s27, %s906_s27 }
   0xc   :  { %p913_p6 = por %p912_p5, %p911_p4 }
   0xe   :  { %p914_p7 = pnand %p913_p6, %p907_p3 }
  0x10   :  { %917 = shalt.err (!%p914_p7)
}
  0x11   :  { %s991_s28 = smov 256   ;;  %s992_s29 = smov 16  }
  0x12   :  { %36 = dma.hbm_to_vmem [thread:$0]  %s1260_s1, 4096, %s31_s19, [#allocation6], %s991_s28, %s991_s28, %s992_s29  }
  0x13   :  { %s993_s7 = smov [#allocation2]   ;;  %s918_s11 = scalar_lea.hbm %s1259_s0, 4096 }
  0x14   :  { %s18_s8 = sshll.u32 %s993_s7, 4  ;;  %p919_p8 = scmp.ne.s32.totalorder %s1259_s0, %s918_s11  ;;  %s19_s8 = int_to_ptr.vmem [resolvable:$true] %s18_s8 }
  0x15   :  { %p922_p9 = scmp.lt.u32.totalorder %s918_s11, %s1259_s0 }
  0x17   :  { %p924_p10 = pnand %p922_p9, %p919_p8 }
  0x19   :  { %927 = shalt.err (!%p924_p10)
}
  0x1a   :  { %s928_s16 = scalar_lea.vmem %s19_s8, 4096  ;;  %p933_p12 = scmp.lt.s32.totalorder %s19_s8, %s19_s8 }
  0x1b   :  { %p929_p11 = scmp.ne.s32.totalorder %s19_s8, %s928_s16  ;;  %p934_p13 = scmp.lt.s32.totalorder %s928_s16, %s928_s16 }
  0x1d   :  { %p935_p0 = por %p934_p13, %p933_p12 }
  0x1f   :  { %p936_p1 = pnand %p935_p0, %p929_p11 }
  0x21   :  { %939 = shalt.err (!%p936_p1)
}
  0x22   :  { %s994_s1 = smov 128   ;;  %s995_s17 = smov 8  }
  0x23   :  { %24 = dma.hbm_to_vmem [thread:$0]  %s1259_s0, 4096, %s19_s8, [#allocation3], %s994_s1, %s994_s1, %s995_s17  }
  0x24   :  { %s996_s20 = smov [#allocation7]   ;;  %s940_s24 = scalar_lea.hbm %s1262_s3, 4096 }
  0x25   :  { %s44_s21 = sshll.u32 %s996_s20, 4  ;;  %p941_p2 = scmp.ne.s32.totalorder %s1262_s3, %s940_s24  ;;  %s45_s21 = int_to_ptr.vmem [resolvable:$true] %s44_s21 }
  0x26   :  { %p944_p3 = scmp.lt.u32.totalorder %s940_s24, %s1262_s3 }
  0x28   :  { %p946_p4 = pnand %p944_p3, %p941_p2 }
  0x2a   :  { %949 = shalt.err (!%p946_p4)
}
  0x2b   :  { %s950_s29 = scalar_lea.vmem %s45_s21, 4096  ;;  %p955_p6 = scmp.lt.s32.totalorder %s45_s21, %s45_s21 }
  0x2c   :  { %p951_p5 = scmp.ne.s32.totalorder %s45_s21, %s950_s29  ;;  %p956_p7 = scmp.lt.s32.totalorder %s950_s29, %s950_s29 }
  0x2e   :  { %p957_p8 = por %p956_p7, %p955_p6 }
  0x30   :  { %p958_p9 = pnand %p957_p8, %p951_p5 }
  0x32   :  { %961 = shalt.err (!%p958_p9)
}
  0x33   :  { %50 = dma.hbm_to_vmem [thread:$0]  %s1262_s3, 4096, %s45_s21, [#allocation6], %s994_s1, %s994_s1, %s995_s17  }
  0x34   :  { %984 = dma.done.wait [#allocation3], 4096  }
  0x35   :  { %985 = vsyncadd [#allocation3], 4294963200 }
  0x36   :  { %986 = dma.done.wait [#allocation6], 8192  }
  0x37   :  { %987 = vsyncadd [#allocation6], 4294959104  ;;  %v997_v0 = vmov 0.0   ;;  %v95_v1 = vld [vmem:[#allocation5 + $0x8] sm:$0xff]  ;;  %v97_v2 = vld [vmem:[#allocation5 + $0x18] sm:$0xff]  ;;  %v998_v53 = vmov 0.0|0.0  }
  0x38   :  { %202 = vmatprep.mubr.f32.mxu0 %v997_v0  ;;  %v94_v3 = vld [vmem:[#allocation5] sm:$0xff]  ;;  %v774_v4 = vpack.c.bf16 %v97_v2, %v95_v1  ;;  %v96_v5 = vld [vmem:[#allocation5 + $0x10] sm:$0xff]  ;;  %v99_v6 = vld [vmem:[#allocation5 + $0x28] sm:$0xff]  ;;  %854 = vmatprep.subr.bf16.mxu1 %v998_v53 }
  0x39   :  { %v101_v7 = vld [vmem:[#allocation5 + $0x38] sm:$0xff]  ;;  %v776_v8 = vpack.c.bf16 %v96_v5, %v94_v3  ;;  %v98_v10 = vld [vmem:[#allocation5 + $0x20] sm:$0xff]  ;;  %v100_v11 = vld [vmem:[#allocation5 + $0x30] sm:$0xff] }
  0x3a   :  { %v778_v9 = vpack.c.bf16 %v101_v7, %v99_v6  ;;  %v103_v12 = vld [vmem:[#allocation5 + $0x48] sm:$0xff]  ;;  %775 = vmatprep.subr.bf16.mxu0 %v774_v4  ;;  %v105_v13 = vld [vmem:[#allocation5 + $0x58] sm:$0xff]  ;;  %v780_v14 = vpack.c.bf16 %v100_v11, %v98_v10  ;;  %v102_v16 = vld [vmem:[#allocation5 + $0x40] sm:$0xff] }
  0x3b   :  { %777 = vmatpush1.bf16.msra.mxu0 %v776_v8  ;;  %v782_v15 = vpack.c.bf16 %v105_v13, %v103_v12  ;;  %v104_v17 = vld [vmem:[#allocation5 + $0x50] sm:$0xff]  ;;  %v107_v18 = vld [vmem:[#allocation5 + $0x68] sm:$0xff]  ;;  %v109_v19 = vld [vmem:[#allocation5 + $0x78] sm:$0xff] }
  0x3c   :  { %779 = vmatprep.subr.bf16.mxu0 %v778_v9  ;;  %v784_v20 = vpack.c.bf16 %v104_v17, %v102_v16  ;;  %v786_v21 = vpack.c.bf16 %v109_v19, %v107_v18  ;;  %v106_v22 = vld [vmem:[#allocation5 + $0x60] sm:$0xff]  ;;  %v108_v23 = vld [vmem:[#allocation5 + $0x70] sm:$0xff]  ;;  %v111_v24 = vld [vmem:[#allocation5 + $0x88] sm:$0xff] }
  0x3d   :  { %v113_v25 = vld [vmem:[#allocation5 + $0x98] sm:$0xff]  ;;  %v788_v26 = vpack.c.bf16 %v108_v23, %v106_v22  ;;  %v110_v28 = vld [vmem:[#allocation5 + $0x80] sm:$0xff]  ;;  %v112_v29 = vld [vmem:[#allocation5 + $0x90] sm:$0xff] }
  0x3e   :  { %v790_v27 = vpack.c.bf16 %v113_v25, %v111_v24  ;;  %v115_v30 = vld [vmem:[#allocation5 + $0xa8] sm:$0xff]  ;;  %v117_v31 = vld [vmem:[#allocation5 + $0xb8] sm:$0xff]  ;;  %v792_v32 = vpack.c.bf16 %v112_v29, %v110_v28  ;;  %v114_v34 = vld [vmem:[#allocation5 + $0xa0] sm:$0xff] }
  0x3f   :  { %781 = vmatpush1.bf16.msra.mxu0 %v780_v14  ;;  %v794_v33 = vpack.c.bf16 %v117_v31, %v115_v30  ;;  %v116_v35 = vld [vmem:[#allocation5 + $0xb0] sm:$0xff]  ;;  %v119_v36 = vld [vmem:[#allocation5 + $0xc8] sm:$0xff]  ;;  %v121_v37 = vld [vmem:[#allocation5 + $0xd8] sm:$0xff] }
  0x40   :  { %783 = vmatprep.subr.bf16.mxu0 %v782_v15  ;;  %v796_v38 = vpack.c.bf16 %v116_v35, %v114_v34  ;;  %v798_v39 = vpack.c.bf16 %v121_v37, %v119_v36  ;;  %v118_v40 = vld [vmem:[#allocation5 + $0xc0] sm:$0xff]  ;;  %v120_v41 = vld [vmem:[#allocation5 + $0xd0] sm:$0xff]  ;;  %v123_v42 = vld [vmem:[#allocation5 + $0xe8] sm:$0xff] }
  0x41   :  { %v125_v43 = vld [vmem:[#allocation5 + $0xf8] sm:$0xff]  ;;  %v800_v44 = vpack.c.bf16 %v120_v41, %v118_v40  ;;  %v122_v46 = vld [vmem:[#allocation5 + $0xe0] sm:$0xff]  ;;  %v124_v47 = vld [vmem:[#allocation5 + $0xf0] sm:$0xff] }
  0x42   :  { %v802_v45 = vpack.c.bf16 %v125_v43, %v123_v42  ;;  %v804_v48 = vpack.c.bf16 %v124_v47, %v122_v46  ;;  %v459_v49 = vld [vmem:[#allocation7] sm:$0xff]  ;;  %v460_v50 = vld [vmem:[#allocation7 + $0x8] sm:$0xff]  ;;  %v461_v54 = vld [vmem:[#allocation7 + $0x10] sm:$0xff] }
  0x43   :  { %785 = vmatpush1.bf16.msra.mxu0 %v784_v20  ;;  %v62_v51 = vld [vmem:[#allocation2] sm:$0xff]  ;;  %v807_v52 = vpack.c.bf16 %v460_v50, %v459_v49  ;;  %v462_v55 = vld [vmem:[#allocation7 + $0x18] sm:$0xff]  ;;  %v63_v56 = vld [vmem:[#allocation2 + $0x8] sm:$0xff] }
  0x44   :  { %787 = vmatprep.subr.bf16.mxu0 %v786_v21  ;;  %v810_v57 = vpack.c.bf16 %v462_v55, %v461_v54  ;;  %v463_v58 = vld [vmem:[#allocation7 + $0x20] sm:$0xff]  ;;  %v464_v59 = vld [vmem:[#allocation7 + $0x28] sm:$0xff]  ;;  %v64_v60 = vld [vmem:[#allocation2 + $0x10] sm:$0xff] }
  0x45   :  { %870 = vmatpush1.bf16.msra.mxu1 %v807_v52  ;;  %v813_v61 = vpack.c.bf16 %v464_v59, %v463_v58  ;;  %v465_v62 = vld [vmem:[#allocation7 + $0x30] sm:$0xff]  ;;  %v466_v63 = vld [vmem:[#allocation7 + $0x38] sm:$0xff]  ;;  %v467_v3 = vld [vmem:[#allocation7 + $0x40] sm:$0xff] }
  0x46   :  { %855 = vmatprep.subr.bf16.mxu1 %v998_v53  ;;  %v65_v1 = vld [vmem:[#allocation2 + $0x18] sm:$0xff]  ;;  %v816_v2 = vpack.c.bf16 %v466_v63, %v465_v62  ;;  %v468_v4 = vld [vmem:[#allocation7 + $0x48] sm:$0xff]  ;;  %v66_v5 = vld [vmem:[#allocation2 + $0x20] sm:$0xff] }
  0x47   :  { %789 = vmatpush1.bf16.msra.mxu0 %v788_v26  ;;  %v819_v6 = vpack.c.bf16 %v468_v4, %v467_v3  ;;  %v469_v7 = vld [vmem:[#allocation7 + $0x50] sm:$0xff]  ;;  %v470_v8 = vld [vmem:[#allocation7 + $0x58] sm:$0xff]  ;;  %v67_v9 = vld [vmem:[#allocation2 + $0x28] sm:$0xff]  ;;  %v128_v4 = vlaneseq }
  0x48   :  { %791 = vmatprep.subr.bf16.mxu0 %v790_v27  ;;  %v822_v10 = vpack.c.bf16 %v470_v8, %v469_v7  ;;  %v471_v11 = vld [vmem:[#allocation7 + $0x60] sm:$0xff]  ;;  %v472_v12 = vld [vmem:[#allocation7 + $0x68] sm:$0xff]  ;;  %v68_v13 = vld [vmem:[#allocation2 + $0x30] sm:$0xff] }
  0x49   :  { %871 = vmatpush1.bf16.msra.mxu1 %v810_v57  ;;  %v825_v14 = vpack.c.bf16 %v472_v12, %v471_v11  ;;  %v473_v15 = vld [vmem:[#allocation7 + $0x70] sm:$0xff]  ;;  %v474_v16 = vld [vmem:[#allocation7 + $0x78] sm:$0xff]  ;;  %v475_v19 = vld [vmem:[#allocation7 + $0x80] sm:$0xff] }
  0x4a   :  { %856 = vmatprep.subr.bf16.mxu1 %v998_v53  ;;  %v69_v17 = vld [vmem:[#allocation2 + $0x38] sm:$0xff]  ;;  %v828_v18 = vpack.c.bf16 %v474_v16, %v473_v15  ;;  %v476_v20 = vld [vmem:[#allocation7 + $0x88] sm:$0xff]  ;;  %v70_v21 = vld [vmem:[#allocation2 + $0x40] sm:$0xff] }
  0x4b   :  { %793 = vmatpush1.bf16.msra.mxu0 %v792_v32  ;;  %v831_v22 = vpack.c.bf16 %v476_v20, %v475_v19  ;;  %v477_v23 = vld [vmem:[#allocation7 + $0x90] sm:$0xff]  ;;  %v478_v24 = vld [vmem:[#allocation7 + $0x98] sm:$0xff]  ;;  %v71_v25 = vld [vmem:[#allocation2 + $0x48] sm:$0xff] }
  0x4c   :  { %795 = vmatprep.subr.bf16.mxu0 %v794_v33  ;;  %v834_v26 = vpack.c.bf16 %v478_v24, %v477_v23  ;;  %v479_v27 = vld [vmem:[#allocation7 + $0xa0] sm:$0xff]  ;;  %v480_v28 = vld [vmem:[#allocation7 + $0xa8] sm:$0xff]  ;;  %v72_v29 = vld [vmem:[#allocation2 + $0x50] sm:$0xff] }
  0x4d   :  { %872 = vmatpush1.bf16.msra.mxu1 %v813_v61  ;;  %v837_v30 = vpack.c.bf16 %v480_v28, %v479_v27  ;;  %v481_v31 = vld [vmem:[#allocation7 + $0xb0] sm:$0xff]  ;;  %v482_v32 = vld [vmem:[#allocation7 + $0xb8] sm:$0xff]  ;;  %v483_v35 = vld [vmem:[#allocation7 + $0xc0] sm:$0xff] }
  0x4e   :  { %857 = vmatprep.subr.bf16.mxu1 %v998_v53  ;;  %v73_v33 = vld [vmem:[#allocation2 + $0x58] sm:$0xff]  ;;  %v840_v34 = vpack.c.bf16 %v482_v32, %v481_v31  ;;  %v484_v36 = vld [vmem:[#allocation7 + $0xc8] sm:$0xff]  ;;  %v74_v37 = vld [vmem:[#allocation2 + $0x60] sm:$0xff] }
  0x4f   :  { %797 = vmatpush1.bf16.msra.mxu0 %v796_v38  ;;  %v843_v38 = vpack.c.bf16 %v484_v36, %v483_v35  ;;  %v486_v40 = vld [vmem:[#allocation7 + $0xd8] sm:$0xff]  ;;  %v75_v41 = vld [vmem:[#allocation2 + $0x68] sm:$0xff]  ;;  %v76_v43 = vld [vmem:[#allocation2 + $0x70] sm:$0xff] }
  0x50   :  { %799 = vmatprep.subr.bf16.mxu0 %v798_v39  ;;  %v485_v39 = vld [vmem:[#allocation7 + $0xd0] sm:$0xff]  ;;  %v79_v46 = vld [vmem:[#allocation2 + $0x88] sm:$0xff]  ;;  %v82_v49 = vld [vmem:[#allocation2 + $0xa0] sm:$0xff] }
  0x51   :  { %873 = vmatpush1.bf16.msra.mxu1 %v816_v2  ;;  %v846_v42 = vpack.c.bf16 %v486_v40, %v485_v39  ;;  %v80_v47 = vld [vmem:[#allocation2 + $0x90] sm:$0xff]  ;;  %v487_v50 = vld [vmem:[#allocation7 + $0xe0] sm:$0xff]  ;;  %v85_v59 = vld [vmem:[#allocation2 + $0xb8] sm:$0xff] }
  0x52   :  { %858 = vmatprep.subr.bf16.mxu1 %v998_v53  ;;  %v489_v55 = vld [vmem:[#allocation7 + $0xf0] sm:$0xff]  ;;  %v90_v63 = vld [vmem:[#allocation2 + $0xe0] sm:$0xff]  ;;  %v93_v3 = vld [vmem:[#allocation2 + $0xf8] sm:$0xff] }
  0x53   :  { %801 = vmatpush1.bf16.msra.mxu0 %v800_v44  ;;  %v77_v44 = vld [vmem:[#allocation2 + $0x78] sm:$0xff]  ;;  %v88_v62 = vld [vmem:[#allocation2 + $0xd0] sm:$0xff]  ;;  %v126_v7 = vld [vmem:[%s1261_s2] sm:$0x3] }
  0x54   :  { %803 = vmatprep.subr.bf16.mxu0 %v802_v45  ;;  %v78_v45 = vld [vmem:[#allocation2 + $0x80] sm:$0xff] }
  0x55   :  { %874 = vmatpush1.bf16.msra.mxu1 %v819_v6 }
  0x56   :  { %859 = vmatprep.subr.bf16.mxu1 %v998_v53 }
  0x57   :  { %805 = vmatpush1.bf16.msra.mxu0 %v804_v48  ;;  %v81_v48 = vld [vmem:[#allocation2 + $0x98] sm:$0xff] }
  0x58   :  { %806 = vmatprep.subr.bf16.mxu0 %v998_v53 }
  0x59   :  { %875 = vmatpush1.bf16.msra.mxu1 %v822_v10 }
  0x5a   :  { %203 = vmatmul.mubr.f32.vlgmr.msra.gmra.mrb[0].mxu0 %v62_v51  ;;  %860 = vmatprep.subr.bf16.mxu1 %v998_v53  ;;  %v488_v51 = vld [vmem:[#allocation7 + $0xe8] sm:$0xff] }
  0x5b   :  { %208 = vmatprep.mubr.f32.mxu0 %v997_v0  ;;  %808 = vmatpush1.bf16.msra.mxu0 %v807_v52  ;;  %v83_v52 = vld [vmem:[#allocation2 + $0xa8] sm:$0xff]  ;;  %v849_v54 = vpack.c.bf16 %v488_v51, %v487_v50 }
  0x5c   :  { %809 = vmatprep.subr.bf16.mxu0 %v998_v53 }
  0x5d   :  { %876 = vmatpush1.bf16.msra.mxu1 %v825_v14 }
  0x5e   :  { %209 = vmatmul.mubr.f32.gmra.mrb[2].mxu0 %v63_v56  ;;  %861 = vmatprep.subr.bf16.mxu1 %v998_v53  ;;  %v490_v56 = vld [vmem:[#allocation7 + $0xf8] sm:$0xff] }
  0x5f   :  { %214 = vmatprep.mubr.f32.mxu0 %v997_v0  ;;  %811 = vmatpush1.bf16.msra.mxu0 %v810_v57  ;;  %v84_v57 = vld [vmem:[#allocation2 + $0xb0] sm:$0xff]  ;;  %v852_v58 = vpack.c.bf16 %v490_v56, %v489_v55 }
  0x60   :  { %812 = vmatprep.subr.bf16.mxu0 %v998_v53 }
  0x61   :  { %877 = vmatpush1.bf16.msra.mxu1 %v828_v18 }
  0x62   :  { %215 = vmatmul.mubr.f32.gmra.mrb[4].mxu0 %v64_v60  ;;  %862 = vmatprep.subr.bf16.mxu1 %v998_v53  ;;  %v86_v60 = vld [vmem:[#allocation2 + $0xc0] sm:$0xff] }
  0x63   :  { %220 = vmatprep.mubr.f32.mxu0 %v997_v0  ;;  %814 = vmatpush1.bf16.msra.mxu0 %v813_v61  ;;  %v87_v61 = vld [vmem:[#allocation2 + $0xc8] sm:$0xff] }
  0x64   :  { %815 = vmatprep.subr.bf16.mxu0 %v998_v53 }
  0x65   :  { %878 = vmatpush1.bf16.msra.mxu1 %v831_v22 }
  0x66   :  { %221 = vmatmul.mubr.f32.gmra.mrb[6].mxu0 %v65_v1  ;;  %863 = vmatprep.subr.bf16.mxu1 %v998_v53  ;;  %v91_v1 = vld [vmem:[#allocation2 + $0xe8] sm:$0xff] }
  0x67   :  { %226 = vmatprep.mubr.f32.mxu0 %v997_v0  ;;  %817 = vmatpush1.bf16.msra.mxu0 %v816_v2  ;;  %v92_v2 = vld [vmem:[#allocation2 + $0xf0] sm:$0xff] }
  0x68   :  { %818 = vmatprep.subr.bf16.mxu0 %v998_v53 }
  0x69   :  { %879 = vmatpush1.bf16.msra.mxu1 %v834_v26 }
  0x6a   :  { %227 = vmatmul.mubr.f32.gmra.mrb[8].mxu0 %v66_v5  ;;  %864 = vmatprep.subr.bf16.mxu1 %v998_v53  ;;  %v129_v5 = vshrl.u32 %v128_v4, 7 }
  0x6b   :  { %232 = vmatprep.mubr.f32.mxu0 %v997_v0  ;;  %820 = vmatpush1.bf16.msra.mxu0 %v819_v6 }
  0x6c   :  { %821 = vmatprep.subr.bf16.mxu0 %v998_v53  ;;  %v130_v6 = vsub.s32 0, %v129_v5  ;;  %v134_v8 = vsub.s32 1, %v129_v5 }
  0x6d   :  { %880 = vmatpush1.bf16.msra.mxu1 %v837_v30 }
  0x6e   :  { %233 = vmatmul.mubr.f32.gmra.mrb[10].mxu0 %v67_v9  ;;  %865 = vmatprep.subr.bf16.mxu1 %v998_v53  ;;  %v1139_v9 = vrot.slane %v126_v7, %v130_v6 }
  0x6f   :  { %238 = vmatprep.mubr.f32.mxu0 %v997_v0  ;;  %823 = vmatpush1.bf16.msra.mxu0 %v822_v10  ;;  %v1141_v10 = vrot.slane %v126_v7, %v134_v8 }
  0x70   :  { %824 = vmatprep.subr.bf16.mxu0 %v998_v53 }
  0x71   :  { %881 = vmatpush1.bf16.msra.mxu1 %v840_v34 }
  0x72   :  { %239 = vmatmul.mubr.f32.gmra.mrb[12].mxu0 %v68_v13  ;;  %866 = vmatprep.subr.bf16.mxu1 %v998_v53 }
  0x73   :  { %244 = vmatprep.mubr.f32.mxu0 %v997_v0  ;;  %826 = vmatpush1.bf16.msra.mxu0 %v825_v14 }
  0x74   :  { %827 = vmatprep.subr.bf16.mxu0 %v998_v53 }
  0x75   :  { %882 = vmatpush1.bf16.msra.mxu1 %v843_v38 }
  0x76   :  { %245 = vmatmul.mubr.f32.gmra.mrb[14].mxu0 %v69_v17  ;;  %867 = vmatprep.subr.bf16.mxu1 %v998_v53 }
  0x77   :  { %250 = vmatprep.mubr.f32.mxu0 %v997_v0  ;;  %829 = vmatpush1.bf16.msra.mxu0 %v828_v18 }
  0x78   :  { %830 = vmatprep.subr.bf16.mxu0 %v998_v53 }
  0x79   :  { %883 = vmatpush1.bf16.msra.mxu1 %v846_v42 }
  0x7a   :  { %251 = vmatmul.mubr.f32.gmra.mrb[16].mxu0 %v70_v21  ;;  %868 = vmatprep.subr.bf16.mxu1 %v998_v53 }
  0x7b   :  { %256 = vmatprep.mubr.f32.mxu0 %v997_v0  ;;  %832 = vmatpush1.bf16.msra.mxu0 %v831_v22 }
  0x7c   :  { %833 = vmatprep.subr.bf16.mxu0 %v998_v53 }
  0x7d   :  { %884 = vmatpush1.bf16.msra.mxu1 %v849_v54 }
  0x7e   :  { %257 = vmatmul.mubr.f32.gmra.mrb[18].mxu0 %v71_v25  ;;  %869 = vmatprep.subr.bf16.mxu1 %v998_v53 }
  0x7f   :  { %262 = vmatprep.mubr.f32.mxu0 %v997_v0  ;;  %835 = vmatpush1.bf16.msra.mxu0 %v834_v26 }
  0x80   :  { %836 = vmatprep.subr.bf16.mxu0 %v998_v53 }
  0x81   :  { %885 = vmatpush1.bf16.msra.mxu1 %v852_v58 }
  0x82   :  { %263 = vmatmul.mubr.f32.gmra.mrb[20].mxu0 %v72_v29 }
  0x83   :  { %268 = vmatprep.mubr.f32.mxu0 %v997_v0  ;;  %838 = vmatpush1.bf16.msra.mxu0 %v837_v30 }
  0x84   :  { %839 = vmatprep.subr.bf16.mxu0 %v998_v53 }
  0x86   :  { %269 = vmatmul.mubr.f32.gmra.mrb[22].mxu0 %v73_v33 }
  0x87   :  { %274 = vmatprep.mubr.f32.mxu0 %v997_v0  ;;  %841 = vmatpush1.bf16.msra.mxu0 %v840_v34 }
  0x88   :  { %842 = vmatprep.subr.bf16.mxu0 %v998_v53 }
  0x8a   :  { %275 = vmatmul.mubr.f32.gmra.mrb[24].mxu0 %v74_v37 }
  0x8b   :  { %280 = vmatprep.mubr.f32.mxu0 %v997_v0  ;;  %844 = vmatpush1.bf16.msra.mxu0 %v843_v38 }
  0x8c   :  { %845 = vmatprep.subr.bf16.mxu0 %v998_v53 }
  0x8e   :  { %281 = vmatmul.mubr.f32.gmra.mrb[26].mxu0 %v75_v41 }
  0x8f   :  { %286 = vmatprep.mubr.f32.mxu0 %v997_v0  ;;  %847 = vmatpush1.bf16.msra.mxu0 %v846_v42 }
  0x90   :  { %848 = vmatprep.subr.bf16.mxu0 %v998_v53 }
  0x92   :  { %287 = vmatmul.mubr.f32.gmra.mrb[28].mxu0 %v76_v43 }
  0x93   :  { %292 = vmatprep.mubr.f32.mxu0 %v997_v0  ;;  %850 = vmatpush1.bf16.msra.mxu0 %v849_v54 }
  0x94   :  { %851 = vmatprep.subr.bf16.mxu0 %v998_v53  ;;  %v89_v53 = vld [vmem:[#allocation2 + $0xd8] sm:$0xff] }
  0x96   :  { %293 = vmatmul.mubr.f32.gmra.mrb[30].mxu0 %v77_v44 }
  0x97   :  { %298 = vmatprep.mubr.f32.mxu0 %v997_v0  ;;  %853 = vmatpush1.bf16.msra.mxu0 %v852_v58 }
  0x9a   :  { %299 = vmatmul.mubr.f32.gmra.mrb[32].mxu0 %v78_v45 }
  0x9b   :  { %304 = vmatprep.mubr.f32.mxu0 %v997_v0 }
  0x9e   :  { %305 = vmatmul.mubr.f32.gmra.mrb[34].mxu0 %v79_v46 }
  0x9f   :  { %310 = vmatprep.mubr.f32.mxu0 %v997_v0 }
  0xa2   :  { %311 = vmatmul.mubr.f32.gmra.mrb[36].mxu0 %v80_v47 }
  0xa3   :  { %316 = vmatprep.mubr.f32.mxu0 %v997_v0 }
  0xa6   :  { %317 = vmatmul.mubr.f32.gmra.mrb[38].mxu0 %v81_v48 }
  0xa7   :  { %322 = vmatprep.mubr.f32.mxu0 %v997_v0 }
  0xaa   :  { %323 = vmatmul.mubr.f32.gmra.mrb[40].mxu0 %v82_v49 }
  0xab   :  { %328 = vmatprep.mubr.f32.mxu0 %v997_v0 }
  0xae   :  { %329 = vmatmul.mubr.f32.gmra.mrb[42].mxu0 %v83_v52 }
  0xaf   :  { %334 = vmatprep.mubr.f32.mxu0 %v997_v0 }
  0xb2   :  { %335 = vmatmul.mubr.f32.gmra.mrb[44].mxu0 %v84_v57 }
  0xb3   :  { %340 = vmatprep.mubr.f32.mxu0 %v997_v0 }
  0xb6   :  { %341 = vmatmul.mubr.f32.gmra.mrb[46].mxu0 %v85_v59 }
  0xb7   :  { %346 = vmatprep.mubr.f32.mxu0 %v997_v0 }
  0xba   :  { %347 = vmatmul.mubr.f32.gmra.mrb[48].mxu0 %v86_v60 }
  0xbb   :  { %352 = vmatprep.mubr.f32.mxu0 %v997_v0 }
  0xbe   :  { %353 = vmatmul.mubr.f32.gmra.mrb[50].mxu0 %v87_v61 }
  0xbf   :  { %358 = vmatprep.mubr.f32.mxu0 %v997_v0 }
  0xc2   :  { %359 = vmatmul.mubr.f32.gmra.mrb[52].mxu0 %v88_v62 }
  0xc3   :  { %364 = vmatprep.mubr.f32.mxu0 %v997_v0 }
  0xc6   :  { %365 = vmatmul.mubr.f32.gmra.mrb[54].mxu0 %v89_v53 }
  0xc7   :  { %370 = vmatprep.mubr.f32.mxu0 %v997_v0 }
  0xca   :  { %371 = vmatmul.mubr.f32.gmra.mrb[56].mxu0 %v90_v63 }
  0xcb   :  { %376 = vmatprep.mubr.f32.mxu0 %v997_v0 }
  0xce   :  { %377 = vmatmul.mubr.f32.gmra.mrb[58].mxu0 %v91_v1 }
  0xcf   :  { %382 = vmatprep.mubr.f32.mxu0 %v997_v0 }
  0xd2   :  { %383 = vmatmul.mubr.f32.gmra.mrb[60].mxu0 %v92_v2 }
  0xd3   :  { %388 = vmatprep.mubr.f32.mxu0 %v997_v0 }
  0xd6   :  { %389 = vmatmul.mubr.f32.gmra.mrb[62].mxu0 %v93_v3 }
 0x12d   :  { %v204_v11 = vpop.f32.mrb[0].mxu0 }
 0x12e   :  { %v205_v12 = vadd.f32 %v204_v11, %v1139_v9  ;;  %v206_v13 = vpop.f32.mrb[1].mxu0 }
 0x12f   :  { %v207_v0 = vadd.f32 %v206_v13, %v1141_v10 }
 0x130   :  { %v395_v16 = vmax.f32 %v205_v12, 0.0 }
 0x131   :  { %v396_v14 = vmax.f32 %v207_v0, 0.0  ;;  %v210_v15 = vpop.f32.mrb[2].mxu0 }
 0x132   :  { %v211_v17 = vadd.f32 %v210_v15, %v1139_v9  ;;  %v212_v18 = vpop.f32.mrb[3].mxu0 }
 0x133   :  { %v213_v19 = vadd.f32 %v212_v18, %v1141_v10  ;;  %562 = vmatprep.mubr.f32.mxu0 %v396_v14 }
 0x134   :  { %563 = vmatmul.mubr.f32.vlgmr.msra.gmra.mrb[64].mxu0 %v395_v16  ;;  %v397_v22 = vmax.f32 %v211_v17, 0.0 }
 0x135   :  { %v398_v20 = vmax.f32 %v213_v19, 0.0  ;;  %v216_v21 = vpop.f32.mrb[4].mxu0 }
 0x136   :  { %v217_v23 = vadd.f32 %v216_v21, %v1139_v9  ;;  %v218_v24 = vpop.f32.mrb[5].mxu0 }
 0x137   :  { %v219_v25 = vadd.f32 %v218_v24, %v1141_v10  ;;  %567 = vmatprep.mubr.f32.mxu0 %v398_v20 }
 0x138   :  { %568 = vmatmul.mubr.f32.gmra.mrb[66].mxu0 %v397_v22  ;;  %v399_v28 = vmax.f32 %v217_v23, 0.0 }
 0x139   :  { %v400_v26 = vmax.f32 %v219_v25, 0.0  ;;  %v222_v27 = vpop.f32.mrb[6].mxu0 }
 0x13a   :  { %v223_v29 = vadd.f32 %v222_v27, %v1139_v9  ;;  %v224_v30 = vpop.f32.mrb[7].mxu0 }
 0x13b   :  { %v225_v31 = vadd.f32 %v224_v30, %v1141_v10  ;;  %572 = vmatprep.mubr.f32.mxu0 %v400_v26 }
 0x13c   :  { %573 = vmatmul.mubr.f32.gmra.mrb[68].mxu0 %v399_v28  ;;  %v401_v34 = vmax.f32 %v223_v29, 0.0 }
 0x13d   :  { %v402_v32 = vmax.f32 %v225_v31, 0.0  ;;  %v228_v33 = vpop.f32.mrb[8].mxu0 }
 0x13e   :  { %v229_v35 = vadd.f32 %v228_v33, %v1139_v9  ;;  %v230_v36 = vpop.f32.mrb[9].mxu0 }
 0x13f   :  { %577 = vmatprep.mubr.f32.mxu0 %v402_v32  ;;  %v231_v37 = vadd.f32 %v230_v36, %v1141_v10 }
 0x140   :  { %578 = vmatmul.mubr.f32.gmra.mrb[70].mxu0 %v401_v34  ;;  %v403_v40 = vmax.f32 %v229_v35, 0.0 }
 0x141   :  { %v234_v38 = vpop.f32.mrb[10].mxu0  ;;  %v404_v39 = vmax.f32 %v231_v37, 0.0 }
 0x142   :  { %v235_v41 = vadd.f32 %v234_v38, %v1139_v9  ;;  %v236_v42 = vpop.f32.mrb[11].mxu0 }
 0x143   :  { %v237_v43 = vadd.f32 %v236_v42, %v1141_v10  ;;  %582 = vmatprep.mubr.f32.mxu1 %v404_v39 }
 0x144   :  { %583 = vmatmul.mubr.f32.vlgmr.msra.gmra.mrb[0].mxu1 %v403_v40  ;;  %v405_v46 = vmax.f32 %v235_v41, 0.0 }
 0x145   :  { %v406_v44 = vmax.f32 %v237_v43, 0.0  ;;  %v240_v45 = vpop.f32.mrb[12].mxu0 }
 0x146   :  { %v241_v47 = vadd.f32 %v240_v45, %v1139_v9  ;;  %v242_v48 = vpop.f32.mrb[13].mxu0 }
 0x147   :  { %v243_v49 = vadd.f32 %v242_v48, %v1141_v10  ;;  %587 = vmatprep.mubr.f32.mxu1 %v406_v44 }
 0x148   :  { %588 = vmatmul.mubr.f32.gmra.mrb[2].mxu1 %v405_v46  ;;  %v407_v52 = vmax.f32 %v241_v47, 0.0 }
 0x149   :  { %v408_v50 = vmax.f32 %v243_v49, 0.0  ;;  %v246_v51 = vpop.f32.mrb[14].mxu0 }
 0x14a   :  { %v247_v54 = vadd.f32 %v246_v51, %v1139_v9  ;;  %v248_v55 = vpop.f32.mrb[15].mxu0 }
 0x14b   :  { %v249_v56 = vadd.f32 %v248_v55, %v1141_v10  ;;  %592 = vmatprep.mubr.f32.mxu1 %v408_v50 }
 0x14c   :  { %593 = vmatmul.mubr.f32.gmra.mrb[4].mxu1 %v407_v52  ;;  %v409_v59 = vmax.f32 %v247_v54, 0.0 }
 0x14d   :  { %v410_v57 = vmax.f32 %v249_v56, 0.0  ;;  %v252_v58 = vpop.f32.mrb[16].mxu0 }
 0x14e   :  { %v253_v60 = vadd.f32 %v252_v58, %v1139_v9  ;;  %v254_v61 = vpop.f32.mrb[17].mxu0 }
 0x14f   :  { %v255_v62 = vadd.f32 %v254_v61, %v1141_v10  ;;  %597 = vmatprep.mubr.f32.mxu1 %v410_v57 }
 0x150   :  { %598 = vmatmul.mubr.f32.gmra.mrb[6].mxu1 %v409_v59  ;;  %v411_v1 = vmax.f32 %v253_v60, 0.0 }
 0x151   :  { %v412_v53 = vmax.f32 %v255_v62, 0.0  ;;  %v258_v63 = vpop.f32.mrb[18].mxu0 }
 0x152   :  { %v259_v2 = vadd.f32 %v258_v63, %v1139_v9  ;;  %v260_v3 = vpop.f32.mrb[19].mxu0 }
 0x153   :  { %v261_v4 = vadd.f32 %v260_v3, %v1141_v10  ;;  %602 = vmatprep.mubr.f32.mxu1 %v412_v53 }
 0x154   :  { %603 = vmatmul.mubr.f32.gmra.mrb[8].mxu1 %v411_v1  ;;  %v413_v7 = vmax.f32 %v259_v2, 0.0 }
 0x155   :  { %v414_v5 = vmax.f32 %v261_v4, 0.0  ;;  %v264_v6 = vpop.f32.mrb[20].mxu0 }
 0x156   :  { %v265_v8 = vadd.f32 %v264_v6, %v1139_v9  ;;  %v266_v11 = vpop.f32.mrb[21].mxu0 }
 0x157   :  { %v267_v12 = vadd.f32 %v266_v11, %v1141_v10  ;;  %607 = vmatprep.mubr.f32.mxu1 %v414_v5 }
 0x158   :  { %608 = vmatmul.mubr.f32.gmra.mrb[10].mxu1 %v413_v7  ;;  %v415_v14 = vmax.f32 %v265_v8, 0.0 }
 0x159   :  { %v416_v13 = vmax.f32 %v267_v12, 0.0  ;;  %v270_v0 = vpop.f32.mrb[22].mxu0 }
 0x15a   :  { %v271_v15 = vadd.f32 %v270_v0, %v1139_v9  ;;  %v272_v16 = vpop.f32.mrb[23].mxu0 }
 0x15b   :  { %v273_v17 = vadd.f32 %v272_v16, %v1141_v10  ;;  %612 = vmatprep.mubr.f32.mxu1 %v416_v13 }
 0x15c   :  { %613 = vmatmul.mubr.f32.gmra.mrb[12].mxu1 %v415_v14  ;;  %v417_v20 = vmax.f32 %v271_v15, 0.0 }
 0x15d   :  { %v418_v18 = vmax.f32 %v273_v17, 0.0  ;;  %v276_v19 = vpop.f32.mrb[24].mxu0 }
 0x15e   :  { %v277_v21 = vadd.f32 %v276_v19, %v1139_v9  ;;  %v278_v22 = vpop.f32.mrb[25].mxu0 }
 0x15f   :  { %v279_v23 = vadd.f32 %v278_v22, %v1141_v10  ;;  %617 = vmatprep.mubr.f32.mxu1 %v418_v18 }
 0x160   :  { %618 = vmatmul.mubr.f32.gmra.mrb[14].mxu1 %v417_v20  ;;  %v419_v26 = vmax.f32 %v277_v21, 0.0 }
 0x161   :  { %v420_v24 = vmax.f32 %v279_v23, 0.0  ;;  %v282_v25 = vpop.f32.mrb[26].mxu0 }
 0x162   :  { %v283_v27 = vadd.f32 %v282_v25, %v1139_v9  ;;  %v284_v28 = vpop.f32.mrb[27].mxu0 }
 0x163   :  { %v285_v29 = vadd.f32 %v284_v28, %v1141_v10  ;;  %622 = vmatprep.mubr.f32.mxu1 %v420_v24 }
 0x164   :  { %623 = vmatmul.mubr.f32.gmra.mrb[16].mxu1 %v419_v26  ;;  %v421_v32 = vmax.f32 %v283_v27, 0.0 }
 0x165   :  { %v422_v30 = vmax.f32 %v285_v29, 0.0  ;;  %v288_v31 = vpop.f32.mrb[28].mxu0 }
 0x166   :  { %v289_v33 = vadd.f32 %v288_v31, %v1139_v9  ;;  %v290_v34 = vpop.f32.mrb[29].mxu0 }
 0x167   :  { %v291_v35 = vadd.f32 %v290_v34, %v1141_v10  ;;  %627 = vmatprep.mubr.f32.mxu1 %v422_v30 }
 0x168   :  { %628 = vmatmul.mubr.f32.gmra.mrb[18].mxu1 %v421_v32  ;;  %v423_v38 = vmax.f32 %v289_v33, 0.0 }
 0x169   :  { %v424_v36 = vmax.f32 %v291_v35, 0.0  ;;  %v294_v37 = vpop.f32.mrb[30].mxu0 }
 0x16a   :  { %v295_v39 = vadd.f32 %v294_v37, %v1139_v9  ;;  %v296_v40 = vpop.f32.mrb[31].mxu0 }
 0x16b   :  { %v297_v41 = vadd.f32 %v296_v40, %v1141_v10  ;;  %632 = vmatprep.mubr.f32.mxu1 %v424_v36 }
 0x16c   :  { %633 = vmatmul.mubr.f32.gmra.mrb[20].mxu1 %v423_v38  ;;  %v425_v44 = vmax.f32 %v295_v39, 0.0 }
 0x16d   :  { %v426_v42 = vmax.f32 %v297_v41, 0.0  ;;  %v300_v43 = vpop.f32.mrb[32].mxu0 }
 0x16e   :  { %v301_v45 = vadd.f32 %v300_v43, %v1139_v9  ;;  %v302_v46 = vpop.f32.mrb[33].mxu0 }
 0x16f   :  { %v303_v47 = vadd.f32 %v302_v46, %v1141_v10  ;;  %637 = vmatprep.mubr.f32.mxu1 %v426_v42 }
 0x170   :  { %638 = vmatmul.mubr.f32.gmra.mrb[22].mxu1 %v425_v44  ;;  %v427_v50 = vmax.f32 %v301_v45, 0.0 }
 0x171   :  { %v428_v48 = vmax.f32 %v303_v47, 0.0  ;;  %v306_v49 = vpop.f32.mrb[34].mxu0 }
 0x172   :  { %v307_v51 = vadd.f32 %v306_v49, %v1139_v9  ;;  %v308_v52 = vpop.f32.mrb[35].mxu0 }
 0x173   :  { %v309_v54 = vadd.f32 %v308_v52, %v1141_v10  ;;  %642 = vmatprep.mubr.f32.mxu1 %v428_v48 }
 0x174   :  { %643 = vmatmul.mubr.f32.gmra.mrb[24].mxu1 %v427_v50  ;;  %v429_v57 = vmax.f32 %v307_v51, 0.0 }
 0x175   :  { %v430_v55 = vmax.f32 %v309_v54, 0.0  ;;  %v312_v56 = vpop.f32.mrb[36].mxu0 }
 0x176   :  { %v313_v58 = vadd.f32 %v312_v56, %v1139_v9  ;;  %v314_v59 = vpop.f32.mrb[37].mxu0 }
 0x177   :  { %v315_v60 = vadd.f32 %v314_v59, %v1141_v10  ;;  %647 = vmatprep.mubr.f32.mxu1 %v430_v55 }
 0x178   :  { %648 = vmatmul.mubr.f32.gmra.mrb[26].mxu1 %v429_v57  ;;  %v431_v53 = vmax.f32 %v313_v58, 0.0 }
 0x179   :  { %v432_v61 = vmax.f32 %v315_v60, 0.0  ;;  %v318_v62 = vpop.f32.mrb[38].mxu0 }
 0x17a   :  { %v319_v63 = vadd.f32 %v318_v62, %v1139_v9  ;;  %v320_v1 = vpop.f32.mrb[39].mxu0 }
 0x17b   :  { %v321_v2 = vadd.f32 %v320_v1, %v1141_v10  ;;  %652 = vmatprep.mubr.f32.mxu1 %v432_v61 }
 0x17c   :  { %653 = vmatmul.mubr.f32.gmra.mrb[28].mxu1 %v431_v53  ;;  %v433_v5 = vmax.f32 %v319_v63, 0.0 }
 0x17d   :  { %v434_v3 = vmax.f32 %v321_v2, 0.0  ;;  %v324_v4 = vpop.f32.mrb[40].mxu0 }
 0x17e   :  { %v325_v6 = vadd.f32 %v324_v4, %v1139_v9  ;;  %v326_v7 = vpop.f32.mrb[41].mxu0 }
 0x17f   :  { %v327_v8 = vadd.f32 %v326_v7, %v1141_v10  ;;  %657 = vmatprep.mubr.f32.mxu1 %v434_v3 }
 0x180   :  { %658 = vmatmul.mubr.f32.gmra.mrb[30].mxu1 %v433_v5  ;;  %v435_v13 = vmax.f32 %v325_v6, 0.0 }
 0x181   :  { %v436_v11 = vmax.f32 %v327_v8, 0.0  ;;  %v330_v12 = vpop.f32.mrb[42].mxu0 }
 0x182   :  { %v331_v0 = vadd.f32 %v330_v12, %v1139_v9  ;;  %v332_v14 = vpop.f32.mrb[43].mxu0 }
 0x183   :  { %v333_v15 = vadd.f32 %v332_v14, %v1141_v10  ;;  %662 = vmatprep.mubr.f32.mxu1 %v436_v11 }
 0x184   :  { %663 = vmatmul.mubr.f32.gmra.mrb[32].mxu1 %v435_v13  ;;  %v437_v18 = vmax.f32 %v331_v0, 0.0 }
 0x185   :  { %v438_v16 = vmax.f32 %v333_v15, 0.0  ;;  %v336_v17 = vpop.f32.mrb[44].mxu0 }
 0x186   :  { %v337_v19 = vadd.f32 %v336_v17, %v1139_v9  ;;  %v338_v20 = vpop.f32.mrb[45].mxu0 }
 0x187   :  { %v339_v21 = vadd.f32 %v338_v20, %v1141_v10  ;;  %667 = vmatprep.mubr.f32.mxu1 %v438_v16  ;;  %v1210_v16 = vld [vmem:[%s1263_s4] ss:$0 sm:$0xff]  ;;  %s999_s4 = smov [#allocation8]  }
 0x188   :  { %668 = vmatmul.mubr.f32.gmra.mrb[34].mxu1 %v437_v18  ;;  %v439_v24 = vmax.f32 %v337_v19, 0.0  ;;  %s760_s8 = sshll.u32 %s999_s4, 4  ;;  %s761_s8 = int_to_ptr.vmem [resolvable:$true] %s760_s8 }
 0x189   :  { %v440_v22 = vmax.f32 %v339_v21, 0.0  ;;  %v342_v23 = vpop.f32.mrb[46].mxu0  ;;  %s962_s9 = scalar_lea.vmem %s761_s8, 4096  ;;  %p967_p11 = scmp.lt.s32.totalorder %s761_s8, %s761_s8 }
 0x18a   :  { %v343_v25 = vadd.f32 %v342_v23, %v1139_v9  ;;  %v344_v26 = vpop.f32.mrb[47].mxu0  ;;  %p963_p10 = scmp.ne.s32.totalorder %s761_s8, %s962_s9  ;;  %p968_p12 = scmp.lt.s32.totalorder %s962_s9, %s962_s9 }
 0x18b   :  { %v345_v27 = vadd.f32 %v344_v26, %v1141_v10  ;;  %672 = vmatprep.mubr.f32.mxu1 %v440_v22 }
 0x18c   :  { %673 = vmatmul.mubr.f32.gmra.mrb[36].mxu1 %v439_v24  ;;  %v441_v30 = vmax.f32 %v343_v25, 0.0  ;;  %p969_p13 = por %p968_p12, %p967_p11 }
 0x18d   :  { %v442_v28 = vmax.f32 %v345_v27, 0.0  ;;  %v348_v29 = vpop.f32.mrb[48].mxu0 }
 0x18e   :  { %v349_v31 = vadd.f32 %v348_v29, %v1139_v9  ;;  %v350_v32 = vpop.f32.mrb[49].mxu0  ;;  %p970_p0 = pnand %p969_p13, %p963_p10 }
 0x18f   :  { %v351_v33 = vadd.f32 %v350_v32, %v1141_v10  ;;  %677 = vmatprep.mubr.f32.mxu1 %v442_v28 }
 0x190   :  { %678 = vmatmul.mubr.f32.gmra.mrb[38].mxu1 %v441_v30  ;;  %v443_v36 = vmax.f32 %v349_v31, 0.0 }
 0x191   :  { %v444_v34 = vmax.f32 %v351_v33, 0.0  ;;  %v354_v35 = vpop.f32.mrb[50].mxu0 }
 0x192   :  { %v355_v37 = vadd.f32 %v354_v35, %v1139_v9  ;;  %v356_v38 = vpop.f32.mrb[51].mxu0 }
 0x193   :  { %v357_v39 = vadd.f32 %v356_v38, %v1141_v10  ;;  %682 = vmatprep.mubr.f32.mxu1 %v444_v34 }
 0x194   :  { %683 = vmatmul.mubr.f32.gmra.mrb[40].mxu1 %v443_v36  ;;  %v445_v42 = vmax.f32 %v355_v37, 0.0 }
 0x195   :  { %v446_v40 = vmax.f32 %v357_v39, 0.0  ;;  %v360_v41 = vpop.f32.mrb[52].mxu0 }
 0x196   :  { %v361_v43 = vadd.f32 %v360_v41, %v1139_v9  ;;  %v362_v44 = vpop.f32.mrb[53].mxu0 }
 0x197   :  { %v363_v45 = vadd.f32 %v362_v44, %v1141_v10  ;;  %687 = vmatprep.mubr.f32.mxu1 %v446_v40 }
 0x198   :  { %688 = vmatmul.mubr.f32.gmra.mrb[42].mxu1 %v445_v42  ;;  %v447_v48 = vmax.f32 %v361_v43, 0.0 }
 0x199   :  { %v448_v46 = vmax.f32 %v363_v45, 0.0  ;;  %v366_v47 = vpop.f32.mrb[54].mxu0 }
 0x19a   :  { %v367_v49 = vadd.f32 %v366_v47, %v1139_v9  ;;  %v368_v50 = vpop.f32.mrb[55].mxu0 }
 0x19b   :  { %v369_v51 = vadd.f32 %v368_v50, %v1141_v10  ;;  %692 = vmatprep.mubr.f32.mxu1 %v448_v46 }
 0x19c   :  { %693 = vmatmul.mubr.f32.gmra.mrb[44].mxu1 %v447_v48  ;;  %v449_v55 = vmax.f32 %v367_v49, 0.0 }
 0x19d   :  { %v450_v52 = vmax.f32 %v369_v51, 0.0  ;;  %v372_v54 = vpop.f32.mrb[56].mxu0 }
 0x19e   :  { %v373_v56 = vadd.f32 %v372_v54, %v1139_v9  ;;  %v374_v57 = vpop.f32.mrb[57].mxu0 }
 0x19f   :  { %v375_v58 = vadd.f32 %v374_v57, %v1141_v10  ;;  %697 = vmatprep.mubr.f32.mxu1 %v450_v52 }
 0x1a0   :  { %698 = vmatmul.mubr.f32.gmra.mrb[46].mxu1 %v449_v55  ;;  %v451_v61 = vmax.f32 %v373_v56, 0.0 }
 0x1a1   :  { %v452_v59 = vmax.f32 %v375_v58, 0.0  ;;  %v378_v60 = vpop.f32.mrb[58].mxu0 }
 0x1a2   :  { %v379_v62 = vadd.f32 %v378_v60, %v1139_v9  ;;  %v380_v53 = vpop.f32.mrb[59].mxu0 }
 0x1a3   :  { %v381_v63 = vadd.f32 %v380_v53, %v1141_v10  ;;  %702 = vmatprep.mubr.f32.mxu1 %v452_v59 }
 0x1a4   :  { %703 = vmatmul.mubr.f32.gmra.mrb[48].mxu1 %v451_v61  ;;  %v453_v3 = vmax.f32 %v379_v62, 0.0 }
 0x1a5   :  { %v454_v1 = vmax.f32 %v381_v63, 0.0  ;;  %v384_v2 = vpop.f32.mrb[60].mxu0 }
 0x1a6   :  { %v385_v4 = vadd.f32 %v384_v2, %v1139_v9  ;;  %v386_v5 = vpop.f32.mrb[61].mxu0 }
 0x1a7   :  { %v387_v6 = vadd.f32 %v386_v5, %v1141_v10  ;;  %707 = vmatprep.mubr.f32.mxu1 %v454_v1 }
 0x1a8   :  { %708 = vmatmul.mubr.f32.gmra.mrb[50].mxu1 %v453_v3  ;;  %v455_v11 = vmax.f32 %v385_v4, 0.0 }
 0x1a9   :  { %v456_v7 = vmax.f32 %v387_v6, 0.0  ;;  %v390_v8 = vpop.f32.mrb[62].mxu0 }
 0x1aa   :  { %v391_v12 = vadd.f32 %v390_v8, %v1139_v9  ;;  %v392_v13 = vpop.f32.mrb[63].mxu0 }
 0x1ab   :  { %v393_v0 = vadd.f32 %v392_v13, %v1141_v10  ;;  %712 = vmatprep.mubr.f32.mxu1 %v456_v7 }
 0x1ac   :  { %713 = vmatmul.mubr.f32.gmra.mrb[52].mxu1 %v455_v11  ;;  %v457_v15 = vmax.f32 %v391_v12, 0.0 }
 0x1ad   :  { %v458_v14 = vmax.f32 %v393_v0, 0.0 }
 0x1af   :  { %717 = vmatprep.mubr.f32.mxu1 %v458_v14 }
 0x1b0   :  { %718 = vmatmul.mubr.f32.gmra.mrb[54].mxu1 %v457_v15 }
 0x207   :  { %v564_v17 = vpop.f32.mrb[64].mxu0 }
 0x208   :  { %v565_v18 = vadd.f32 %v1210_v16, %v564_v17  ;;  %v566_v19 = vpop.f32.mrb[65].mxu0 }
 0x20a   :  { %723 = vst [vmem:[#allocation8] sm:$0xff] %v565_v18 }
 0x20b   :  { %v569_v9 = vpop.f32.mrb[66].mxu0 }
 0x20c   :  { %v570_v20 = vadd.f32 %v1210_v16, %v569_v9  ;;  %v571_v10 = vpop.f32.mrb[67].mxu0 }
 0x20e   :  { %724 = vst [vmem:[#allocation8 + $0x8] sm:$0xff] %v570_v20 }
 0x20f   :  { %v574_v21 = vpop.f32.mrb[68].mxu0 }
 0x210   :  { %v575_v22 = vadd.f32 %v1210_v16, %v574_v21  ;;  %v576_v23 = vpop.f32.mrb[69].mxu0 }
 0x212   :  { %725 = vst [vmem:[#allocation8 + $0x10] sm:$0xff] %v575_v22 }
 0x213   :  { %v579_v24 = vpop.f32.mrb[70].mxu0 }
 0x214   :  { %v580_v25 = vadd.f32 %v1210_v16, %v579_v24  ;;  %v581_v26 = vpop.f32.mrb[71].mxu0 }
 0x216   :  { %726 = vst [vmem:[#allocation8 + $0x18] sm:$0xff] %v580_v25 }
 0x217   :  { %v584_v27 = vpop.f32.mrb[0].mxu1 }
 0x218   :  { %v585_v28 = vadd.f32 %v1210_v16, %v584_v27  ;;  %v586_v29 = vpop.f32.mrb[1].mxu1 }
 0x21a   :  { %727 = vst [vmem:[#allocation8 + $0x20] sm:$0xff] %v585_v28 }
 0x21b   :  { %v589_v30 = vpop.f32.mrb[2].mxu1 }
 0x21c   :  { %v590_v31 = vadd.f32 %v1210_v16, %v589_v30  ;;  %v591_v32 = vpop.f32.mrb[3].mxu1 }
 0x21e   :  { %728 = vst [vmem:[#allocation8 + $0x28] sm:$0xff] %v590_v31 }
 0x21f   :  { %v594_v33 = vpop.f32.mrb[4].mxu1 }
 0x220   :  { %v595_v34 = vadd.f32 %v1210_v16, %v594_v33  ;;  %v596_v35 = vpop.f32.mrb[5].mxu1 }
 0x222   :  { %729 = vst [vmem:[#allocation8 + $0x30] sm:$0xff] %v595_v34 }
 0x223   :  { %v599_v36 = vpop.f32.mrb[6].mxu1 }
 0x224   :  { %v600_v37 = vadd.f32 %v1210_v16, %v599_v36  ;;  %v601_v38 = vpop.f32.mrb[7].mxu1 }
 0x226   :  { %730 = vst [vmem:[#allocation8 + $0x38] sm:$0xff] %v600_v37 }
 0x227   :  { %v604_v39 = vpop.f32.mrb[8].mxu1 }
 0x228   :  { %v605_v40 = vadd.f32 %v1210_v16, %v604_v39  ;;  %v606_v41 = vpop.f32.mrb[9].mxu1 }
 0x22a   :  { %731 = vst [vmem:[#allocation8 + $0x40] sm:$0xff] %v605_v40 }
 0x22b   :  { %v609_v42 = vpop.f32.mrb[10].mxu1 }
 0x22c   :  { %v610_v43 = vadd.f32 %v1210_v16, %v609_v42  ;;  %v611_v44 = vpop.f32.mrb[11].mxu1 }
 0x22e   :  { %732 = vst [vmem:[#allocation8 + $0x48] sm:$0xff] %v610_v43 }
 0x22f   :  { %v614_v45 = vpop.f32.mrb[12].mxu1 }
 0x230   :  { %v615_v46 = vadd.f32 %v1210_v16, %v614_v45  ;;  %v616_v47 = vpop.f32.mrb[13].mxu1 }
 0x232   :  { %733 = vst [vmem:[#allocation8 + $0x50] sm:$0xff] %v615_v46 }
 0x233   :  { %v619_v48 = vpop.f32.mrb[14].mxu1 }
 0x234   :  { %v620_v49 = vadd.f32 %v1210_v16, %v619_v48  ;;  %v621_v50 = vpop.f32.mrb[15].mxu1 }
 0x236   :  { %734 = vst [vmem:[#allocation8 + $0x58] sm:$0xff] %v620_v49 }
 0x237   :  { %v624_v51 = vpop.f32.mrb[16].mxu1 }
 0x238   :  { %v625_v52 = vadd.f32 %v1210_v16, %v624_v51  ;;  %v626_v54 = vpop.f32.mrb[17].mxu1 }
 0x23a   :  { %735 = vst [vmem:[#allocation8 + $0x60] sm:$0xff] %v625_v52 }
 0x23b   :  { %v629_v55 = vpop.f32.mrb[18].mxu1 }
 0x23c   :  { %v630_v56 = vadd.f32 %v1210_v16, %v629_v55  ;;  %v631_v57 = vpop.f32.mrb[19].mxu1 }
 0x23e   :  { %736 = vst [vmem:[#allocation8 + $0x68] sm:$0xff] %v630_v56 }
 0x23f   :  { %v634_v58 = vpop.f32.mrb[20].mxu1 }
 0x240   :  { %v635_v59 = vadd.f32 %v1210_v16, %v634_v58  ;;  %v636_v60 = vpop.f32.mrb[21].mxu1 }
 0x242   :  { %737 = vst [vmem:[#allocation8 + $0x70] sm:$0xff] %v635_v59 }
 0x243   :  { %v639_v61 = vpop.f32.mrb[22].mxu1 }
 0x244   :  { %v640_v62 = vadd.f32 %v1210_v16, %v639_v61  ;;  %v641_v53 = vpop.f32.mrb[23].mxu1 }
 0x246   :  { %738 = vst [vmem:[#allocation8 + $0x78] sm:$0xff] %v640_v62 }
 0x247   :  { %v644_v63 = vpop.f32.mrb[24].mxu1 }
 0x248   :  { %v645_v1 = vadd.f32 %v1210_v16, %v644_v63  ;;  %v646_v2 = vpop.f32.mrb[25].mxu1 }
 0x24a   :  { %739 = vst [vmem:[#allocation8 + $0x80] sm:$0xff] %v645_v1 }
 0x24b   :  { %v649_v3 = vpop.f32.mrb[26].mxu1 }
 0x24c   :  { %v650_v4 = vadd.f32 %v1210_v16, %v649_v3  ;;  %v651_v5 = vpop.f32.mrb[27].mxu1 }
 0x24e   :  { %740 = vst [vmem:[#allocation8 + $0x88] sm:$0xff] %v650_v4 }
 0x24f   :  { %v654_v6 = vpop.f32.mrb[28].mxu1 }
 0x250   :  { %v655_v7 = vadd.f32 %v1210_v16, %v654_v6  ;;  %v656_v8 = vpop.f32.mrb[29].mxu1 }
 0x252   :  { %741 = vst [vmem:[#allocation8 + $0x90] sm:$0xff] %v655_v7 }
 0x253   :  { %v659_v11 = vpop.f32.mrb[30].mxu1 }
 0x254   :  { %v660_v12 = vadd.f32 %v1210_v16, %v659_v11  ;;  %v661_v13 = vpop.f32.mrb[31].mxu1 }
 0x256   :  { %742 = vst [vmem:[#allocation8 + $0x98] sm:$0xff] %v660_v12 }
 0x257   :  { %v664_v0 = vpop.f32.mrb[32].mxu1 }
 0x258   :  { %v665_v14 = vadd.f32 %v1210_v16, %v664_v0  ;;  %v666_v15 = vpop.f32.mrb[33].mxu1 }
 0x25a   :  { %743 = vst [vmem:[#allocation8 + $0xa0] sm:$0xff] %v665_v14 }
 0x25b   :  { %v669_v17 = vpop.f32.mrb[34].mxu1 }
 0x25c   :  { %v670_v18 = vadd.f32 %v1210_v16, %v669_v17  ;;  %v671_v19 = vpop.f32.mrb[35].mxu1 }
 0x25e   :  { %744 = vst [vmem:[#allocation8 + $0xa8] sm:$0xff] %v670_v18 }
 0x25f   :  { %v674_v9 = vpop.f32.mrb[36].mxu1 }
 0x260   :  { %v675_v20 = vadd.f32 %v1210_v16, %v674_v9  ;;  %v676_v10 = vpop.f32.mrb[37].mxu1 }
 0x262   :  { %745 = vst [vmem:[#allocation8 + $0xb0] sm:$0xff] %v675_v20 }
 0x263   :  { %v679_v21 = vpop.f32.mrb[38].mxu1 }
 0x264   :  { %v680_v22 = vadd.f32 %v1210_v16, %v679_v21  ;;  %v681_v23 = vpop.f32.mrb[39].mxu1 }
 0x266   :  { %746 = vst [vmem:[#allocation8 + $0xb8] sm:$0xff] %v680_v22 }
 0x267   :  { %v684_v24 = vpop.f32.mrb[40].mxu1 }
 0x268   :  { %v685_v25 = vadd.f32 %v1210_v16, %v684_v24  ;;  %v686_v26 = vpop.f32.mrb[41].mxu1 }
 0x26a   :  { %747 = vst [vmem:[#allocation8 + $0xc0] sm:$0xff] %v685_v25 }
 0x26b   :  { %v689_v27 = vpop.f32.mrb[42].mxu1 }
 0x26c   :  { %v690_v28 = vadd.f32 %v1210_v16, %v689_v27  ;;  %v691_v29 = vpop.f32.mrb[43].mxu1 }
 0x26e   :  { %748 = vst [vmem:[#allocation8 + $0xc8] sm:$0xff] %v690_v28 }
 0x26f   :  { %v694_v30 = vpop.f32.mrb[44].mxu1 }
 0x270   :  { %v695_v31 = vadd.f32 %v1210_v16, %v694_v30  ;;  %v696_v32 = vpop.f32.mrb[45].mxu1 }
 0x272   :  { %749 = vst [vmem:[#allocation8 + $0xd0] sm:$0xff] %v695_v31 }
 0x273   :  { %v699_v33 = vpop.f32.mrb[46].mxu1 }
 0x274   :  { %v700_v34 = vadd.f32 %v1210_v16, %v699_v33  ;;  %v701_v35 = vpop.f32.mrb[47].mxu1 }
 0x276   :  { %750 = vst [vmem:[#allocation8 + $0xd8] sm:$0xff] %v700_v34 }
 0x277   :  { %v704_v36 = vpop.f32.mrb[48].mxu1 }
 0x278   :  { %v705_v37 = vadd.f32 %v1210_v16, %v704_v36  ;;  %v706_v38 = vpop.f32.mrb[49].mxu1 }
 0x27a   :  { %751 = vst [vmem:[#allocation8 + $0xe0] sm:$0xff] %v705_v37 }
 0x27b   :  { %v709_v39 = vpop.f32.mrb[50].mxu1 }
 0x27c   :  { %v710_v40 = vadd.f32 %v1210_v16, %v709_v39  ;;  %v711_v41 = vpop.f32.mrb[51].mxu1 }
 0x27e   :  { %752 = vst [vmem:[#allocation8 + $0xe8] sm:$0xff] %v710_v40 }
 0x27f   :  { %v714_v42 = vpop.f32.mrb[52].mxu1 }
 0x280   :  { %v715_v43 = vadd.f32 %v1210_v16, %v714_v42  ;;  %v716_v44 = vpop.f32.mrb[53].mxu1 }
 0x282   :  { %753 = vst [vmem:[#allocation8 + $0xf0] sm:$0xff] %v715_v43 }
 0x283   :  { %v719_v45 = vpop.f32.mrb[54].mxu1 }
 0x284   :  { %v720_v46 = vadd.f32 %v1210_v16, %v719_v45  ;;  %v721_v47 = vpop.f32.mrb[55].mxu1 }
 0x286   :  { %754 = vst [vmem:[#allocation8 + $0xf8] sm:$0xff] %v720_v46 }
 0x287   :  { %973 = shalt.err (!%p970_p0)
}
 0x288   :  { %s974_s12 = scalar_lea.hbm %s1264_s5, 4096 }
 0x289   :  { %p975_p1 = scmp.ne.s32.totalorder %s1264_s5, %s974_s12  ;;  %p978_p2 = scmp.lt.u32.totalorder %s974_s12, %s1264_s5 }
 0x28b   :  { %p980_p3 = pnand %p978_p2, %p975_p1 }
 0x28d   :  { %983 = shalt.err (!%p980_p3)
}
 0x28e   :  { %766 = dma.vmem_to_hbm [thread:$0]  %s761_s8, 4096, %s1264_s5, [#allocation4], %s994_s1, %s994_s1, %s995_s17  }
 0x28f   :  { %988 = dma.done.wait [#allocation4], 4096  }
 0x290   :  { %989 = vsyncadd [#allocation4], 4294963200 }
 0x291   :  { %770 = vsyncpa [#allocation3], 1 }
 0x292   :  { %771 = vsyncpa [#allocation6], 1 }
 0x293   :  { %772 = vsyncpa [#allocation4], 1 }

</bundles_post_ra>
